<compile_context>
chip_gen: v6e
topology: v6e:2x2x1
jax: 0.10.0
libtpu: 0.0.40
codegen_flags: <defaults>
</compile_context>

<pallas_src>
import functools
import math

import jax
import jax.numpy as jnp
from jax import lax
from jax.experimental import pallas as pl
from jax.experimental.pallas import tpu as pltpu


def _asloss_block_kernel(p_ref, out_ref, *, temperature, base_temperature):
    """One grid step: TB independent prototype matrices, batch on lanes.

    p_ref:   (C, D, TB) prototypes (any float dtype) in VMEM.
    out_ref: (1, TB) float32 losses in VMEM (lane-dense).
    """
    p = p_ref[...].astype(jnp.float32)                            # (C, D, TB)
    C, D, TB = p.shape

    inv_t = 1.0 / float(temperature)
    scale = float(temperature) / float(base_temperature)
    target = 1.0 / (1.0 - float(C))
    log_cm1 = math.log(float(C - 1))

    # L2-normalize each prototype: rsqrt (EUP) + multiply (VPU).  Zero-norm
    # rows produce NaN exactly like the PyTorch reference (norm + divide, no
    # eps); they are dropped by the isnan filter below.
    inv_norm = lax.rsqrt(jnp.sum(p * p, axis=1, keepdims=True))   # (C, 1, TB)
    pn = p * inv_norm                                             # (C, D, TB)

    # Off-diagonal Gram entries on the VPU: broadcast-multiply over (D, TB)
    # slabs + sublane reduce, vectorized across the TB batch on lanes.  The
    # Gram is symmetric, so each of the C*(C-1)/2 pairs feeds both row sums.
    nums = [jnp.zeros((1, TB), jnp.float32) for _ in range(C)]
    for i in range(C):
        for j in range(i + 1, C):
            d_ij = jnp.sum(pn[i] * pn[j], axis=0, keepdims=True)  # (1, TB)
            e_ij = jnp.exp((d_ij - target) ** 2 * inv_t)          # EUP exp
            nums[i] = nums[i] + e_ij
            nums[j] = nums[j] + e_ij

    # mean_prob_neg_i = log(num_i / (C - 1)); drop NaN rows; mean over valid.
    loss_sum = jnp.zeros((1, TB), jnp.float32)
    valid_cnt = jnp.zeros((1, TB), jnp.float32)
    for i in range(C):
        mpn_i = jnp.log(nums[i]) - log_cm1                        # (1, TB)
        valid = jnp.logical_not(jnp.isnan(mpn_i))
        loss_sum = loss_sum + jnp.where(valid, mpn_i, 0.0)
        valid_cnt = valid_cnt + valid.astype(jnp.float32)

    # NOTE: if every row is NaN, valid_cnt == 0 and this yields NaN -- same as
    # the PyTorch reference (mean of an empty tensor).
    out_ref[...] = scale * (loss_sum / valid_cnt)


def asloss_batched(prototypes_batch, *, temperature=0.1, base_temperature=0.1,
                   block_b=256):
    """Batched ASLoss: (B, n_cls, feat_dim) -> (B,) float32 losses.

    One pallas_call; each grid step handles `block_b` matrices so per-step
    overhead and DMA fixed cost are amortized.  The batch axis is placed on
    the lane dimension so in-kernel math and the output stores are lane-dense.
    """
    B, C, D = prototypes_batch.shape
    if B <= block_b:
        tb, b_pad = B, B
    else:
        tb = block_b
        b_pad = pl.cdiv(B, tb) * tb
    if b_pad != B:
        # Padded (all-zero) matrices yield NaN losses confined to their own
        # lanes; they are sliced off below and never touch real results.
        prototypes_batch = jnp.pad(
            prototypes_batch, ((0, b_pad - B), (0, 0), (0, 0)))

    # (B, C, D) -> (C, D, B): batch on lanes (layout plumbing in XLA).  The
    # input dtype is preserved; the only f32 cast happens inside the kernel.
    p_t = jnp.transpose(prototypes_batch, (1, 2, 0))

    kernel = functools.partial(
        _asloss_block_kernel,
        temperature=float(temperature),
        base_temperature=float(base_temperature),
    )
    out = pl.pallas_call(
        kernel,
        out_shape=jax.ShapeDtypeStruct((1, b_pad), jnp.float32),
        grid=(b_pad // tb,),
        in_specs=[pl.BlockSpec((C, D, tb), lambda b: (0, 0, b))],
        out_specs=pl.BlockSpec((1, tb), lambda b: (0, b)),
        compiler_params=pltpu.CompilerParams(
            dimension_semantics=("parallel",)),
    )(p_t)
    return out[0, :B]


def asloss(prototypes, *, temperature=0.1, base_temperature=0.1):
    """ASLoss.forward for one (n_cls, feat_dim) matrix -> scalar float32.

    Routed through the batched kernel (B=1).  For a genuinely one-off tiny
    evaluation the pure-JAX `_asloss_ref` is cheaper than any Pallas launch;
    repeated evaluations should be stacked and sent through `asloss_batched`.
    """
    return asloss_batched(prototypes[None],
                          temperature=temperature,
                          base_temperature=base_temperature)[0]


def _asloss_ref(prototypes, temperature=0.1, base_temperature=0.1):
    """Pure-JAX reference matching the PyTorch forward."""
    p = prototypes.astype(jnp.float32)
    C = p.shape[0]
    pn = p / jnp.linalg.norm(p, axis=1, keepdims=True)
    gram = jnp.dot(pn, pn.T, precision=lax.Precision.HIGHEST)
    logits = (gram - 1.0 / (1.0 - C)) ** 2 / temperature
    mask = 1.0 - jnp.eye(C, dtype=jnp.float32)
    mpn = jnp.log((mask * jnp.exp(logits)).sum(1) / mask.sum(1))
    valid = ~jnp.isnan(mpn)
    mean_val = jnp.where(valid, mpn, 0.0).sum() / valid.sum()
    return temperature / base_temperature * mean_val


if __name__ == "__main__":
    key = jax.random.PRNGKey(0)
    k_single, k_batch = jax.random.split(key)

    n_cls, feat_dim = 8, 32   # args.n_cls = 8; prototypes: (n_cls, feat_dim)

    # Single-matrix path (the PyTorch module's forward).
    prototypes = jax.random.normal(k_single, (n_cls, feat_dim),
                                   dtype=jnp.float32)
    loss = jax.block_until_ready(
        asloss(prototypes, temperature=0.1, base_temperature=0.1))
    ref = _asloss_ref(prototypes, temperature=0.1, base_temperature=0.1)
    assert jnp.allclose(loss, ref, rtol=1e-4, atol=1e-4), (loss, ref)

    # Batched path: exercises a multi-step grid (block_b=128 -> 2 grid steps)
    # plus batch padding (200 -> 256).
    B = 200
    protos_b = jax.random.normal(k_batch, (B, n_cls, feat_dim),
                                 dtype=jnp.float32)
    losses = jax.block_until_ready(
        asloss_batched(protos_b, temperature=0.1, base_temperature=0.1,
                       block_b=128))
    refs = jax.vmap(_asloss_ref)(protos_b)
    assert jnp.allclose(losses, refs, rtol=1e-4, atol=1e-4), (losses, refs)

    print("KERNEL_OK")
</pallas_src>

<mosaic_0001>
module attributes {stable_mosaic.version = 11 : i64} {
  func.func @_asloss_block_kernel(%arg0: i32, %arg1: memref<8x32x1xf32, #tpu.memory_space<vmem>>, %arg2: memref<1x1xf32, #tpu.memory_space<vmem>>) attributes {dimension_semantics = [#tpu.dimension_semantics<parallel>], iteration_bounds = array<i64: 1>, scalar_prefetch = 0 : i64, scratch_operands = 0 : i64, tpu.core_type = #tpu.core_type<tc>, window_params = [{transform_indices = @transform_0, window_bounds = array<i64: 8, 32, 1>}, {transform_indices = @transform_1, window_bounds = array<i64: 1, 1>}]} {
    %c0 = arith.constant 0 : index
    %c0_0 = arith.constant 0 : index
    %c0_1 = arith.constant 0 : index
    %0 = vector.load %arg1[%c0, %c0_0, %c0_1] : memref<8x32x1xf32, #tpu.memory_space<vmem>>, vector<8x32x1xf32>
    %1 = arith.mulf %0, %0 : vector<8x32x1xf32>
    %cst = arith.constant dense<0.000000e+00> : vector<8x1xf32>
    %2 = vector.multi_reduction <add>, %1, %cst [1] : vector<8x32x1xf32> to vector<8x1xf32>
    %3 = vector.shape_cast %2 : vector<8x1xf32> to vector<8x1x1xf32>
    %4 = math.rsqrt %3 : vector<8x1x1xf32>
    %5 = vector.broadcast %4 : vector<8x1x1xf32> to vector<8x32x1xf32>
    %6 = arith.mulf %0, %5 : vector<8x32x1xf32>
    %cst_2 = arith.constant 0.000000e+00 : f32
    %7 = vector.broadcast %cst_2 : f32 to vector<1x1xf32>
    %cst_3 = arith.constant 0.000000e+00 : f32
    %8 = vector.broadcast %cst_3 : f32 to vector<1x1xf32>
    %cst_4 = arith.constant 0.000000e+00 : f32
    %9 = vector.broadcast %cst_4 : f32 to vector<1x1xf32>
    %cst_5 = arith.constant 0.000000e+00 : f32
    %10 = vector.broadcast %cst_5 : f32 to vector<1x1xf32>
    %cst_6 = arith.constant 0.000000e+00 : f32
    %11 = vector.broadcast %cst_6 : f32 to vector<1x1xf32>
    %cst_7 = arith.constant 0.000000e+00 : f32
    %12 = vector.broadcast %cst_7 : f32 to vector<1x1xf32>
    %cst_8 = arith.constant 0.000000e+00 : f32
    %13 = vector.broadcast %cst_8 : f32 to vector<1x1xf32>
    %cst_9 = arith.constant 0.000000e+00 : f32
    %14 = vector.broadcast %cst_9 : f32 to vector<1x1xf32>
    %15 = vector.extract_strided_slice %6 {offsets = [0, 0, 0], sizes = [1, 32, 1], strides = [1, 1, 1]} : vector<8x32x1xf32> to vector<1x32x1xf32>
    %16 = vector.shape_cast %15 : vector<1x32x1xf32> to vector<32x1xf32>
    %17 = vector.extract_strided_slice %6 {offsets = [1, 0, 0], sizes = [1, 32, 1], strides = [1, 1, 1]} : vector<8x32x1xf32> to vector<1x32x1xf32>
    %18 = vector.shape_cast %17 : vector<1x32x1xf32> to vector<32x1xf32>
    %19 = arith.mulf %16, %18 : vector<32x1xf32>
    %cst_10 = arith.constant dense<0.000000e+00> : vector<1xf32>
    %20 = vector.multi_reduction <add>, %19, %cst_10 [0] : vector<32x1xf32> to vector<1xf32>
    %21 = vector.shape_cast %20 : vector<1xf32> to vector<1x1xf32>
    %cst_11 = arith.constant -0.142857149 : f32
    %22 = vector.broadcast %cst_11 : f32 to vector<1x1xf32>
    %23 = arith.subf %21, %22 : vector<1x1xf32>
    %24 = arith.mulf %23, %23 : vector<1x1xf32>
    %cst_12 = arith.constant 1.000000e+01 : f32
    %25 = vector.broadcast %cst_12 : f32 to vector<1x1xf32>
    %26 = arith.mulf %24, %25 : vector<1x1xf32>
    %27 = math.exp %26 : vector<1x1xf32>
    %28 = arith.addf %7, %27 : vector<1x1xf32>
    %29 = arith.addf %8, %27 : vector<1x1xf32>
    %30 = vector.extract_strided_slice %6 {offsets = [0, 0, 0], sizes = [1, 32, 1], strides = [1, 1, 1]} : vector<8x32x1xf32> to vector<1x32x1xf32>
    %31 = vector.shape_cast %30 : vector<1x32x1xf32> to vector<32x1xf32>
    %32 = vector.extract_strided_slice %6 {offsets = [2, 0, 0], sizes = [1, 32, 1], strides = [1, 1, 1]} : vector<8x32x1xf32> to vector<1x32x1xf32>
    %33 = vector.shape_cast %32 : vector<1x32x1xf32> to vector<32x1xf32>
    %34 = arith.mulf %31, %33 : vector<32x1xf32>
    %cst_13 = arith.constant dense<0.000000e+00> : vector<1xf32>
    %35 = vector.multi_reduction <add>, %34, %cst_13 [0] : vector<32x1xf32> to vector<1xf32>
    %36 = vector.shape_cast %35 : vector<1xf32> to vector<1x1xf32>
    %cst_14 = arith.constant -0.142857149 : f32
    %37 = vector.broadcast %cst_14 : f32 to vector<1x1xf32>
    %38 = arith.subf %36, %37 : vector<1x1xf32>
    %39 = arith.mulf %38, %38 : vector<1x1xf32>
    %cst_15 = arith.constant 1.000000e+01 : f32
    %40 = vector.broadcast %cst_15 : f32 to vector<1x1xf32>
    %41 = arith.mulf %39, %40 : vector<1x1xf32>
    %42 = math.exp %41 : vector<1x1xf32>
    %43 = arith.addf %28, %42 : vector<1x1xf32>
    %44 = arith.addf %9, %42 : vector<1x1xf32>
    %45 = vector.extract_strided_slice %6 {offsets = [0, 0, 0], sizes = [1, 32, 1], strides = [1, 1, 1]} : vector<8x32x1xf32> to vector<1x32x1xf32>
    %46 = vector.shape_cast %45 : vector<1x32x1xf32> to vector<32x1xf32>
    %47 = vector.extract_strided_slice %6 {offsets = [3, 0, 0], sizes = [1, 32, 1], strides = [1, 1, 1]} : vector<8x32x1xf32> to vector<1x32x1xf32>
    %48 = vector.shape_cast %47 : vector<1x32x1xf32> to vector<32x1xf32>
    %49 = arith.mulf %46, %48 : vector<32x1xf32>
    %cst_16 = arith.constant dense<0.000000e+00> : vector<1xf32>
    %50 = vector.multi_reduction <add>, %49, %cst_16 [0] : vector<32x1xf32> to vector<1xf32>
    %51 = vector.shape_cast %50 : vector<1xf32> to vector<1x1xf32>
    %cst_17 = arith.constant -0.142857149 : f32
    %52 = vector.broadcast %cst_17 : f32 to vector<1x1xf32>
    %53 = arith.subf %51, %52 : vector<1x1xf32>
    %54 = arith.mulf %53, %53 : vector<1x1xf32>
    %cst_18 = arith.constant 1.000000e+01 : f32
    %55 = vector.broadcast %cst_18 : f32 to vector<1x1xf32>
    %56 = arith.mulf %54, %55 : vector<1x1xf32>
    %57 = math.exp %56 : vector<1x1xf32>
    %58 = arith.addf %43, %57 : vector<1x1xf32>
    %59 = arith.addf %10, %57 : vector<1x1xf32>
    %60 = vector.extract_strided_slice %6 {offsets = [0, 0, 0], sizes = [1, 32, 1], strides = [1, 1, 1]} : vector<8x32x1xf32> to vector<1x32x1xf32>
    %61 = vector.shape_cast %60 : vector<1x32x1xf32> to vector<32x1xf32>
    %62 = vector.extract_strided_slice %6 {offsets = [4, 0, 0], sizes = [1, 32, 1], strides = [1, 1, 1]} : vector<8x32x1xf32> to vector<1x32x1xf32>
    %63 = vector.shape_cast %62 : vector<1x32x1xf32> to vector<32x1xf32>
    %64 = arith.mulf %61, %63 : vector<32x1xf32>
    %cst_19 = arith.constant dense<0.000000e+00> : vector<1xf32>
    %65 = vector.multi_reduction <add>, %64, %cst_19 [0] : vector<32x1xf32> to vector<1xf32>
    %66 = vector.shape_cast %65 : vector<1xf32> to vector<1x1xf32>
    %cst_20 = arith.constant -0.142857149 : f32
    %67 = vector.broadcast %cst_20 : f32 to vector<1x1xf32>
    %68 = arith.subf %66, %67 : vector<1x1xf32>
    %69 = arith.mulf %68, %68 : vector<1x1xf32>
    %cst_21 = arith.constant 1.000000e+01 : f32
    %70 = vector.broadcast %cst_21 : f32 to vector<1x1xf32>
    %71 = arith.mulf %69, %70 : vector<1x1xf32>
    %72 = math.exp %71 : vector<1x1xf32>
    %73 = arith.addf %58, %72 : vector<1x1xf32>
    %74 = arith.addf %11, %72 : vector<1x1xf32>
    %75 = vector.extract_strided_slice %6 {offsets = [0, 0, 0], sizes = [1, 32, 1], strides = [1, 1, 1]} : vector<8x32x1xf32> to vector<1x32x1xf32>
    %76 = vector.shape_cast %75 : vector<1x32x1xf32> to vector<32x1xf32>
    %77 = vector.extract_strided_slice %6 {offsets = [5, 0, 0], sizes = [1, 32, 1], strides = [1, 1, 1]} : vector<8x32x1xf32> to vector<1x32x1xf32>
    %78 = vector.shape_cast %77 : vector<1x32x1xf32> to vector<32x1xf32>
    %79 = arith.mulf %76, %78 : vector<32x1xf32>
    %cst_22 = arith.constant dense<0.000000e+00> : vector<1xf32>
    %80 = vector.multi_reduction <add>, %79, %cst_22 [0] : vector<32x1xf32> to vector<1xf32>
    %81 = vector.shape_cast %80 : vector<1xf32> to vector<1x1xf32>
    %cst_23 = arith.constant -0.142857149 : f32
    %82 = vector.broadcast %cst_23 : f32 to vector<1x1xf32>
    %83 = arith.subf %81, %82 : vector<1x1xf32>
    %84 = arith.mulf %83, %83 : vector<1x1xf32>
    %cst_24 = arith.constant 1.000000e+01 : f32
    %85 = vector.broadcast %cst_24 : f32 to vector<1x1xf32>
    %86 = arith.mulf %84, %85 : vector<1x1xf32>
    %87 = math.exp %86 : vector<1x1xf32>
    %88 = arith.addf %73, %87 : vector<1x1xf32>
    %89 = arith.addf %12, %87 : vector<1x1xf32>
    %90 = vector.extract_strided_slice %6 {offsets = [0, 0, 0], sizes = [1, 32, 1], strides = [1, 1, 1]} : vector<8x32x1xf32> to vector<1x32x1xf32>
    %91 = vector.shape_cast %90 : vector<1x32x1xf32> to vector<32x1xf32>
    %92 = vector.extract_strided_slice %6 {offsets = [6, 0, 0], sizes = [1, 32, 1], strides = [1, 1, 1]} : vector<8x32x1xf32> to vector<1x32x1xf32>
    %93 = vector.shape_cast %92 : vector<1x32x1xf32> to vector<32x1xf32>
    %94 = arith.mulf %91, %93 : vector<32x1xf32>
    %cst_25 = arith.constant dense<0.000000e+00> : vector<1xf32>
    %95 = vector.multi_reduction <add>, %94, %cst_25 [0] : vector<32x1xf32> to vector<1xf32>
    %96 = vector.shape_cast %95 : vector<1xf32> to vector<1x1xf32>
    %cst_26 = arith.constant -0.142857149 : f32
    %97 = vector.broadcast %cst_26 : f32 to vector<1x1xf32>
    %98 = arith.subf %96, %97 : vector<1x1xf32>
    %99 = arith.mulf %98, %98 : vector<1x1xf32>
    %cst_27 = arith.constant 1.000000e+01 : f32
    %100 = vector.broadcast %cst_27 : f32 to vector<1x1xf32>
    %101 = arith.mulf %99, %100 : vector<1x1xf32>
    %102 = math.exp %101 : vector<1x1xf32>
    %103 = arith.addf %88, %102 : vector<1x1xf32>
    %104 = arith.addf %13, %102 : vector<1x1xf32>
    %105 = vector.extract_strided_slice %6 {offsets = [0, 0, 0], sizes = [1, 32, 1], strides = [1, 1, 1]} : vector<8x32x1xf32> to vector<1x32x1xf32>
    %106 = vector.shape_cast %105 : vector<1x32x1xf32> to vector<32x1xf32>
    %107 = vector.extract_strided_slice %6 {offsets = [7, 0, 0], sizes = [1, 32, 1], strides = [1, 1, 1]} : vector<8x32x1xf32> to vector<1x32x1xf32>
    %108 = vector.shape_cast %107 : vector<1x32x1xf32> to vector<32x1xf32>
    %109 = arith.mulf %106, %108 : vector<32x1xf32>
    %cst_28 = arith.constant dense<0.000000e+00> : vector<1xf32>
    %110 = vector.multi_reduction <add>, %109, %cst_28 [0] : vector<32x1xf32> to vector<1xf32>
    %111 = vector.shape_cast %110 : vector<1xf32> to vector<1x1xf32>
    %cst_29 = arith.constant -0.142857149 : f32
    %112 = vector.broadcast %cst_29 : f32 to vector<1x1xf32>
    %113 = arith.subf %111, %112 : vector<1x1xf32>
    %114 = arith.mulf %113, %113 : vector<1x1xf32>
    %cst_30 = arith.constant 1.000000e+01 : f32
    %115 = vector.broadcast %cst_30 : f32 to vector<1x1xf32>
    %116 = arith.mulf %114, %115 : vector<1x1xf32>
    %117 = math.exp %116 : vector<1x1xf32>
    %118 = arith.addf %103, %117 : vector<1x1xf32>
    %119 = arith.addf %14, %117 : vector<1x1xf32>
    %120 = vector.extract_strided_slice %6 {offsets = [1, 0, 0], sizes = [1, 32, 1], strides = [1, 1, 1]} : vector<8x32x1xf32> to vector<1x32x1xf32>
    %121 = vector.shape_cast %120 : vector<1x32x1xf32> to vector<32x1xf32>
    %122 = vector.extract_strided_slice %6 {offsets = [2, 0, 0], sizes = [1, 32, 1], strides = [1, 1, 1]} : vector<8x32x1xf32> to vector<1x32x1xf32>
    %123 = vector.shape_cast %122 : vector<1x32x1xf32> to vector<32x1xf32>
    %124 = arith.mulf %121, %123 : vector<32x1xf32>
    %cst_31 = arith.constant dense<0.000000e+00> : vector<1xf32>
    %125 = vector.multi_reduction <add>, %124, %cst_31 [0] : vector<32x1xf32> to vector<1xf32>
    %126 = vector.shape_cast %125 : vector<1xf32> to vector<1x1xf32>
    %cst_32 = arith.constant -0.142857149 : f32
    %127 = vector.broadcast %cst_32 : f32 to vector<1x1xf32>
    %128 = arith.subf %126, %127 : vector<1x1xf32>
    %129 = arith.mulf %128, %128 : vector<1x1xf32>
    %cst_33 = arith.constant 1.000000e+01 : f32
    %130 = vector.broadcast %cst_33 : f32 to vector<1x1xf32>
    %131 = arith.mulf %129, %130 : vector<1x1xf32>
    %132 = math.exp %131 : vector<1x1xf32>
    %133 = arith.addf %29, %132 : vector<1x1xf32>
    %134 = arith.addf %44, %132 : vector<1x1xf32>
    %135 = vector.extract_strided_slice %6 {offsets = [1, 0, 0], sizes = [1, 32, 1], strides = [1, 1, 1]} : vector<8x32x1xf32> to vector<1x32x1xf32>
    %136 = vector.shape_cast %135 : vector<1x32x1xf32> to vector<32x1xf32>
    %137 = vector.extract_strided_slice %6 {offsets = [3, 0, 0], sizes = [1, 32, 1], strides = [1, 1, 1]} : vector<8x32x1xf32> to vector<1x32x1xf32>
    %138 = vector.shape_cast %137 : vector<1x32x1xf32> to vector<32x1xf32>
    %139 = arith.mulf %136, %138 : vector<32x1xf32>
    %cst_34 = arith.constant dense<0.000000e+00> : vector<1xf32>
    %140 = vector.multi_reduction <add>, %139, %cst_34 [0] : vector<32x1xf32> to vector<1xf32>
    %141 = vector.shape_cast %140 : vector<1xf32> to vector<1x1xf32>
    %cst_35 = arith.constant -0.142857149 : f32
    %142 = vector.broadcast %cst_35 : f32 to vector<1x1xf32>
    %143 = arith.subf %141, %142 : vector<1x1xf32>
    %144 = arith.mulf %143, %143 : vector<1x1xf32>
    %cst_36 = arith.constant 1.000000e+01 : f32
    %145 = vector.broadcast %cst_36 : f32 to vector<1x1xf32>
    %146 = arith.mulf %144, %145 : vector<1x1xf32>
    %147 = math.exp %146 : vector<1x1xf32>
    %148 = arith.addf %133, %147 : vector<1x1xf32>
    %149 = arith.addf %59, %147 : vector<1x1xf32>
    %150 = vector.extract_strided_slice %6 {offsets = [1, 0, 0], sizes = [1, 32, 1], strides = [1, 1, 1]} : vector<8x32x1xf32> to vector<1x32x1xf32>
    %151 = vector.shape_cast %150 : vector<1x32x1xf32> to vector<32x1xf32>
    %152 = vector.extract_strided_slice %6 {offsets = [4, 0, 0], sizes = [1, 32, 1], strides = [1, 1, 1]} : vector<8x32x1xf32> to vector<1x32x1xf32>
    %153 = vector.shape_cast %152 : vector<1x32x1xf32> to vector<32x1xf32>
    %154 = arith.mulf %151, %153 : vector<32x1xf32>
    %cst_37 = arith.constant dense<0.000000e+00> : vector<1xf32>
    %155 = vector.multi_reduction <add>, %154, %cst_37 [0] : vector<32x1xf32> to vector<1xf32>
    %156 = vector.shape_cast %155 : vector<1xf32> to vector<1x1xf32>
    %cst_38 = arith.constant -0.142857149 : f32
    %157 = vector.broadcast %cst_38 : f32 to vector<1x1xf32>
    %158 = arith.subf %156, %157 : vector<1x1xf32>
    %159 = arith.mulf %158, %158 : vector<1x1xf32>
    %cst_39 = arith.constant 1.000000e+01 : f32
    %160 = vector.broadcast %cst_39 : f32 to vector<1x1xf32>
    %161 = arith.mulf %159, %160 : vector<1x1xf32>
    %162 = math.exp %161 : vector<1x1xf32>
    %163 = arith.addf %148, %162 : vector<1x1xf32>
    %164 = arith.addf %74, %162 : vector<1x1xf32>
    %165 = vector.extract_strided_slice %6 {offsets = [1, 0, 0], sizes = [1, 32, 1], strides = [1, 1, 1]} : vector<8x32x1xf32> to vector<1x32x1xf32>
    %166 = vector.shape_cast %165 : vector<1x32x1xf32> to vector<32x1xf32>
    %167 = vector.extract_strided_slice %6 {offsets = [5, 0, 0], sizes = [1, 32, 1], strides = [1, 1, 1]} : vector<8x32x1xf32> to vector<1x32x1xf32>
    %168 = vector.shape_cast %167 : vector<1x32x1xf32> to vector<32x1xf32>
    %169 = arith.mulf %166, %168 : vector<32x1xf32>
    %cst_40 = arith.constant dense<0.000000e+00> : vector<1xf32>
    %170 = vector.multi_reduction <add>, %169, %cst_40 [0] : vector<32x1xf32> to vector<1xf32>
    %171 = vector.shape_cast %170 : vector<1xf32> to vector<1x1xf32>
    %cst_41 = arith.constant -0.142857149 : f32
    %172 = vector.broadcast %cst_41 : f32 to vector<1x1xf32>
    %173 = arith.subf %171, %172 : vector<1x1xf32>
    %174 = arith.mulf %173, %173 : vector<1x1xf32>
    %cst_42 = arith.constant 1.000000e+01 : f32
    %175 = vector.broadcast %cst_42 : f32 to vector<1x1xf32>
    %176 = arith.mulf %174, %175 : vector<1x1xf32>
    %177 = math.exp %176 : vector<1x1xf32>
    %178 = arith.addf %163, %177 : vector<1x1xf32>
    %179 = arith.addf %89, %177 : vector<1x1xf32>
    %180 = vector.extract_strided_slice %6 {offsets = [1, 0, 0], sizes = [1, 32, 1], strides = [1, 1, 1]} : vector<8x32x1xf32> to vector<1x32x1xf32>
    %181 = vector.shape_cast %180 : vector<1x32x1xf32> to vector<32x1xf32>
    %182 = vector.extract_strided_slice %6 {offsets = [6, 0, 0], sizes = [1, 32, 1], strides = [1, 1, 1]} : vector<8x32x1xf32> to vector<1x32x1xf32>
    %183 = vector.shape_cast %182 : vector<1x32x1xf32> to vector<32x1xf32>
    %184 = arith.mulf %181, %183 : vector<32x1xf32>
    %cst_43 = arith.constant dense<0.000000e+00> : vector<1xf32>
    %185 = vector.multi_reduction <add>, %184, %cst_43 [0] : vector<32x1xf32> to vector<1xf32>
    %186 = vector.shape_cast %185 : vector<1xf32> to vector<1x1xf32>
    %cst_44 = arith.constant -0.142857149 : f32
    %187 = vector.broadcast %cst_44 : f32 to vector<1x1xf32>
    %188 = arith.subf %186, %187 : vector<1x1xf32>
    %189 = arith.mulf %188, %188 : vector<1x1xf32>
    %cst_45 = arith.constant 1.000000e+01 : f32
    %190 = vector.broadcast %cst_45 : f32 to vector<1x1xf32>
    %191 = arith.mulf %189, %190 : vector<1x1xf32>
    %192 = math.exp %191 : vector<1x1xf32>
    %193 = arith.addf %178, %192 : vector<1x1xf32>
    %194 = arith.addf %104, %192 : vector<1x1xf32>
    %195 = vector.extract_strided_slice %6 {offsets = [1, 0, 0], sizes = [1, 32, 1], strides = [1, 1, 1]} : vector<8x32x1xf32> to vector<1x32x1xf32>
    %196 = vector.shape_cast %195 : vector<1x32x1xf32> to vector<32x1xf32>
    %197 = vector.extract_strided_slice %6 {offsets = [7, 0, 0], sizes = [1, 32, 1], strides = [1, 1, 1]} : vector<8x32x1xf32> to vector<1x32x1xf32>
    %198 = vector.shape_cast %197 : vector<1x32x1xf32> to vector<32x1xf32>
    %199 = arith.mulf %196, %198 : vector<32x1xf32>
    %cst_46 = arith.constant dense<0.000000e+00> : vector<1xf32>
    %200 = vector.multi_reduction <add>, %199, %cst_46 [0] : vector<32x1xf32> to vector<1xf32>
    %201 = vector.shape_cast %200 : vector<1xf32> to vector<1x1xf32>
    %cst_47 = arith.constant -0.142857149 : f32
    %202 = vector.broadcast %cst_47 : f32 to vector<1x1xf32>
    %203 = arith.subf %201, %202 : vector<1x1xf32>
    %204 = arith.mulf %203, %203 : vector<1x1xf32>
    %cst_48 = arith.constant 1.000000e+01 : f32
    %205 = vector.broadcast %cst_48 : f32 to vector<1x1xf32>
    %206 = arith.mulf %204, %205 : vector<1x1xf32>
    %207 = math.exp %206 : vector<1x1xf32>
    %208 = arith.addf %193, %207 : vector<1x1xf32>
    %209 = arith.addf %119, %207 : vector<1x1xf32>
    %210 = vector.extract_strided_slice %6 {offsets = [2, 0, 0], sizes = [1, 32, 1], strides = [1, 1, 1]} : vector<8x32x1xf32> to vector<1x32x1xf32>
    %211 = vector.shape_cast %210 : vector<1x32x1xf32> to vector<32x1xf32>
    %212 = vector.extract_strided_slice %6 {offsets = [3, 0, 0], sizes = [1, 32, 1], strides = [1, 1, 1]} : vector<8x32x1xf32> to vector<1x32x1xf32>
    %213 = vector.shape_cast %212 : vector<1x32x1xf32> to vector<32x1xf32>
    %214 = arith.mulf %211, %213 : vector<32x1xf32>
    %cst_49 = arith.constant dense<0.000000e+00> : vector<1xf32>
    %215 = vector.multi_reduction <add>, %214, %cst_49 [0] : vector<32x1xf32> to vector<1xf32>
    %216 = vector.shape_cast %215 : vector<1xf32> to vector<1x1xf32>
    %cst_50 = arith.constant -0.142857149 : f32
    %217 = vector.broadcast %cst_50 : f32 to vector<1x1xf32>
    %218 = arith.subf %216, %217 : vector<1x1xf32>
    %219 = arith.mulf %218, %218 : vector<1x1xf32>
    %cst_51 = arith.constant 1.000000e+01 : f32
    %220 = vector.broadcast %cst_51 : f32 to vector<1x1xf32>
    %221 = arith.mulf %219, %220 : vector<1x1xf32>
    %222 = math.exp %221 : vector<1x1xf32>
    %223 = arith.addf %134, %222 : vector<1x1xf32>
    %224 = arith.addf %149, %222 : vector<1x1xf32>
    %225 = vector.extract_strided_slice %6 {offsets = [2, 0, 0], sizes = [1, 32, 1], strides = [1, 1, 1]} : vector<8x32x1xf32> to vector<1x32x1xf32>
    %226 = vector.shape_cast %225 : vector<1x32x1xf32> to vector<32x1xf32>
    %227 = vector.extract_strided_slice %6 {offsets = [4, 0, 0], sizes = [1, 32, 1], strides = [1, 1, 1]} : vector<8x32x1xf32> to vector<1x32x1xf32>
    %228 = vector.shape_cast %227 : vector<1x32x1xf32> to vector<32x1xf32>
    %229 = arith.mulf %226, %228 : vector<32x1xf32>
    %cst_52 = arith.constant dense<0.000000e+00> : vector<1xf32>
    %230 = vector.multi_reduction <add>, %229, %cst_52 [0] : vector<32x1xf32> to vector<1xf32>
    %231 = vector.shape_cast %230 : vector<1xf32> to vector<1x1xf32>
    %cst_53 = arith.constant -0.142857149 : f32
    %232 = vector.broadcast %cst_53 : f32 to vector<1x1xf32>
    %233 = arith.subf %231, %232 : vector<1x1xf32>
    %234 = arith.mulf %233, %233 : vector<1x1xf32>
    %cst_54 = arith.constant 1.000000e+01 : f32
    %235 = vector.broadcast %cst_54 : f32 to vector<1x1xf32>
    %236 = arith.mulf %234, %235 : vector<1x1xf32>
    %237 = math.exp %236 : vector<1x1xf32>
    %238 = arith.addf %223, %237 : vector<1x1xf32>
    %239 = arith.addf %164, %237 : vector<1x1xf32>
    %240 = vector.extract_strided_slice %6 {offsets = [2, 0, 0], sizes = [1, 32, 1], strides = [1, 1, 1]} : vector<8x32x1xf32> to vector<1x32x1xf32>
    %241 = vector.shape_cast %240 : vector<1x32x1xf32> to vector<32x1xf32>
    %242 = vector.extract_strided_slice %6 {offsets = [5, 0, 0], sizes = [1, 32, 1], strides = [1, 1, 1]} : vector<8x32x1xf32> to vector<1x32x1xf32>
    %243 = vector.shape_cast %242 : vector<1x32x1xf32> to vector<32x1xf32>
    %244 = arith.mulf %241, %243 : vector<32x1xf32>
    %cst_55 = arith.constant dense<0.000000e+00> : vector<1xf32>
    %245 = vector.multi_reduction <add>, %244, %cst_55 [0] : vector<32x1xf32> to vector<1xf32>
    %246 = vector.shape_cast %245 : vector<1xf32> to vector<1x1xf32>
    %cst_56 = arith.constant -0.142857149 : f32
    %247 = vector.broadcast %cst_56 : f32 to vector<1x1xf32>
    %248 = arith.subf %246, %247 : vector<1x1xf32>
    %249 = arith.mulf %248, %248 : vector<1x1xf32>
    %cst_57 = arith.constant 1.000000e+01 : f32
    %250 = vector.broadcast %cst_57 : f32 to vector<1x1xf32>
    %251 = arith.mulf %249, %250 : vector<1x1xf32>
    %252 = math.exp %251 : vector<1x1xf32>
    %253 = arith.addf %238, %252 : vector<1x1xf32>
    %254 = arith.addf %179, %252 : vector<1x1xf32>
    %255 = vector.extract_strided_slice %6 {offsets = [2, 0, 0], sizes = [1, 32, 1], strides = [1, 1, 1]} : vector<8x32x1xf32> to vector<1x32x1xf32>
    %256 = vector.shape_cast %255 : vector<1x32x1xf32> to vector<32x1xf32>
    %257 = vector.extract_strided_slice %6 {offsets = [6, 0, 0], sizes = [1, 32, 1], strides = [1, 1, 1]} : vector<8x32x1xf32> to vector<1x32x1xf32>
    %258 = vector.shape_cast %257 : vector<1x32x1xf32> to vector<32x1xf32>
    %259 = arith.mulf %256, %258 : vector<32x1xf32>
    %cst_58 = arith.constant dense<0.000000e+00> : vector<1xf32>
    %260 = vector.multi_reduction <add>, %259, %cst_58 [0] : vector<32x1xf32> to vector<1xf32>
    %261 = vector.shape_cast %260 : vector<1xf32> to vector<1x1xf32>
    %cst_59 = arith.constant -0.142857149 : f32
    %262 = vector.broadcast %cst_59 : f32 to vector<1x1xf32>
    %263 = arith.subf %261, %262 : vector<1x1xf32>
    %264 = arith.mulf %263, %263 : vector<1x1xf32>
    %cst_60 = arith.constant 1.000000e+01 : f32
    %265 = vector.broadcast %cst_60 : f32 to vector<1x1xf32>
    %266 = arith.mulf %264, %265 : vector<1x1xf32>
    %267 = math.exp %266 : vector<1x1xf32>
    %268 = arith.addf %253, %267 : vector<1x1xf32>
    %269 = arith.addf %194, %267 : vector<1x1xf32>
    %270 = vector.extract_strided_slice %6 {offsets = [2, 0, 0], sizes = [1, 32, 1], strides = [1, 1, 1]} : vector<8x32x1xf32> to vector<1x32x1xf32>
    %271 = vector.shape_cast %270 : vector<1x32x1xf32> to vector<32x1xf32>
    %272 = vector.extract_strided_slice %6 {offsets = [7, 0, 0], sizes = [1, 32, 1], strides = [1, 1, 1]} : vector<8x32x1xf32> to vector<1x32x1xf32>
    %273 = vector.shape_cast %272 : vector<1x32x1xf32> to vector<32x1xf32>
    %274 = arith.mulf %271, %273 : vector<32x1xf32>
    %cst_61 = arith.constant dense<0.000000e+00> : vector<1xf32>
    %275 = vector.multi_reduction <add>, %274, %cst_61 [0] : vector<32x1xf32> to vector<1xf32>
    %276 = vector.shape_cast %275 : vector<1xf32> to vector<1x1xf32>
    %cst_62 = arith.constant -0.142857149 : f32
    %277 = vector.broadcast %cst_62 : f32 to vector<1x1xf32>
    %278 = arith.subf %276, %277 : vector<1x1xf32>
    %279 = arith.mulf %278, %278 : vector<1x1xf32>
    %cst_63 = arith.constant 1.000000e+01 : f32
    %280 = vector.broadcast %cst_63 : f32 to vector<1x1xf32>
    %281 = arith.mulf %279, %280 : vector<1x1xf32>
    %282 = math.exp %281 : vector<1x1xf32>
    %283 = arith.addf %268, %282 : vector<1x1xf32>
    %284 = arith.addf %209, %282 : vector<1x1xf32>
    %285 = vector.extract_strided_slice %6 {offsets = [3, 0, 0], sizes = [1, 32, 1], strides = [1, 1, 1]} : vector<8x32x1xf32> to vector<1x32x1xf32>
    %286 = vector.shape_cast %285 : vector<1x32x1xf32> to vector<32x1xf32>
    %287 = vector.extract_strided_slice %6 {offsets = [4, 0, 0], sizes = [1, 32, 1], strides = [1, 1, 1]} : vector<8x32x1xf32> to vector<1x32x1xf32>
    %288 = vector.shape_cast %287 : vector<1x32x1xf32> to vector<32x1xf32>
    %289 = arith.mulf %286, %288 : vector<32x1xf32>
    %cst_64 = arith.constant dense<0.000000e+00> : vector<1xf32>
    %290 = vector.multi_reduction <add>, %289, %cst_64 [0] : vector<32x1xf32> to vector<1xf32>
    %291 = vector.shape_cast %290 : vector<1xf32> to vector<1x1xf32>
    %cst_65 = arith.constant -0.142857149 : f32
    %292 = vector.broadcast %cst_65 : f32 to vector<1x1xf32>
    %293 = arith.subf %291, %292 : vector<1x1xf32>
    %294 = arith.mulf %293, %293 : vector<1x1xf32>
    %cst_66 = arith.constant 1.000000e+01 : f32
    %295 = vector.broadcast %cst_66 : f32 to vector<1x1xf32>
    %296 = arith.mulf %294, %295 : vector<1x1xf32>
    %297 = math.exp %296 : vector<1x1xf32>
    %298 = arith.addf %224, %297 : vector<1x1xf32>
    %299 = arith.addf %239, %297 : vector<1x1xf32>
    %300 = vector.extract_strided_slice %6 {offsets = [3, 0, 0], sizes = [1, 32, 1], strides = [1, 1, 1]} : vector<8x32x1xf32> to vector<1x32x1xf32>
    %301 = vector.shape_cast %300 : vector<1x32x1xf32> to vector<32x1xf32>
    %302 = vector.extract_strided_slice %6 {offsets = [5, 0, 0], sizes = [1, 32, 1], strides = [1, 1, 1]} : vector<8x32x1xf32> to vector<1x32x1xf32>
    %303 = vector.shape_cast %302 : vector<1x32x1xf32> to vector<32x1xf32>
    %304 = arith.mulf %301, %303 : vector<32x1xf32>
    %cst_67 = arith.constant dense<0.000000e+00> : vector<1xf32>
    %305 = vector.multi_reduction <add>, %304, %cst_67 [0] : vector<32x1xf32> to vector<1xf32>
    %306 = vector.shape_cast %305 : vector<1xf32> to vector<1x1xf32>
    %cst_68 = arith.constant -0.142857149 : f32
    %307 = vector.broadcast %cst_68 : f32 to vector<1x1xf32>
    %308 = arith.subf %306, %307 : vector<1x1xf32>
    %309 = arith.mulf %308, %308 : vector<1x1xf32>
    %cst_69 = arith.constant 1.000000e+01 : f32
    %310 = vector.broadcast %cst_69 : f32 to vector<1x1xf32>
    %311 = arith.mulf %309, %310 : vector<1x1xf32>
    %312 = math.exp %311 : vector<1x1xf32>
    %313 = arith.addf %298, %312 : vector<1x1xf32>
    %314 = arith.addf %254, %312 : vector<1x1xf32>
    %315 = vector.extract_strided_slice %6 {offsets = [3, 0, 0], sizes = [1, 32, 1], strides = [1, 1, 1]} : vector<8x32x1xf32> to vector<1x32x1xf32>
    %316 = vector.shape_cast %315 : vector<1x32x1xf32> to vector<32x1xf32>
    %317 = vector.extract_strided_slice %6 {offsets = [6, 0, 0], sizes = [1, 32, 1], strides = [1, 1, 1]} : vector<8x32x1xf32> to vector<1x32x1xf32>
    %318 = vector.shape_cast %317 : vector<1x32x1xf32> to vector<32x1xf32>
    %319 = arith.mulf %316, %318 : vector<32x1xf32>
    %cst_70 = arith.constant dense<0.000000e+00> : vector<1xf32>
    %320 = vector.multi_reduction <add>, %319, %cst_70 [0] : vector<32x1xf32> to vector<1xf32>
    %321 = vector.shape_cast %320 : vector<1xf32> to vector<1x1xf32>
    %cst_71 = arith.constant -0.142857149 : f32
    %322 = vector.broadcast %cst_71 : f32 to vector<1x1xf32>
    %323 = arith.subf %321, %322 : vector<1x1xf32>
    %324 = arith.mulf %323, %323 : vector<1x1xf32>
    %cst_72 = arith.constant 1.000000e+01 : f32
    %325 = vector.broadcast %cst_72 : f32 to vector<1x1xf32>
    %326 = arith.mulf %324, %325 : vector<1x1xf32>
    %327 = math.exp %326 : vector<1x1xf32>
    %328 = arith.addf %313, %327 : vector<1x1xf32>
    %329 = arith.addf %269, %327 : vector<1x1xf32>
    %330 = vector.extract_strided_slice %6 {offsets = [3, 0, 0], sizes = [1, 32, 1], strides = [1, 1, 1]} : vector<8x32x1xf32> to vector<1x32x1xf32>
    %331 = vector.shape_cast %330 : vector<1x32x1xf32> to vector<32x1xf32>
    %332 = vector.extract_strided_slice %6 {offsets = [7, 0, 0], sizes = [1, 32, 1], strides = [1, 1, 1]} : vector<8x32x1xf32> to vector<1x32x1xf32>
    %333 = vector.shape_cast %332 : vector<1x32x1xf32> to vector<32x1xf32>
    %334 = arith.mulf %331, %333 : vector<32x1xf32>
    %cst_73 = arith.constant dense<0.000000e+00> : vector<1xf32>
    %335 = vector.multi_reduction <add>, %334, %cst_73 [0] : vector<32x1xf32> to vector<1xf32>
    %336 = vector.shape_cast %335 : vector<1xf32> to vector<1x1xf32>
    %cst_74 = arith.constant -0.142857149 : f32
    %337 = vector.broadcast %cst_74 : f32 to vector<1x1xf32>
    %338 = arith.subf %336, %337 : vector<1x1xf32>
    %339 = arith.mulf %338, %338 : vector<1x1xf32>
    %cst_75 = arith.constant 1.000000e+01 : f32
    %340 = vector.broadcast %cst_75 : f32 to vector<1x1xf32>
    %341 = arith.mulf %339, %340 : vector<1x1xf32>
    %342 = math.exp %341 : vector<1x1xf32>
    %343 = arith.addf %328, %342 : vector<1x1xf32>
    %344 = arith.addf %284, %342 : vector<1x1xf32>
    %345 = vector.extract_strided_slice %6 {offsets = [4, 0, 0], sizes = [1, 32, 1], strides = [1, 1, 1]} : vector<8x32x1xf32> to vector<1x32x1xf32>
    %346 = vector.shape_cast %345 : vector<1x32x1xf32> to vector<32x1xf32>
    %347 = vector.extract_strided_slice %6 {offsets = [5, 0, 0], sizes = [1, 32, 1], strides = [1, 1, 1]} : vector<8x32x1xf32> to vector<1x32x1xf32>
    %348 = vector.shape_cast %347 : vector<1x32x1xf32> to vector<32x1xf32>
    %349 = arith.mulf %346, %348 : vector<32x1xf32>
    %cst_76 = arith.constant dense<0.000000e+00> : vector<1xf32>
    %350 = vector.multi_reduction <add>, %349, %cst_76 [0] : vector<32x1xf32> to vector<1xf32>
    %351 = vector.shape_cast %350 : vector<1xf32> to vector<1x1xf32>
    %cst_77 = arith.constant -0.142857149 : f32
    %352 = vector.broadcast %cst_77 : f32 to vector<1x1xf32>
    %353 = arith.subf %351, %352 : vector<1x1xf32>
    %354 = arith.mulf %353, %353 : vector<1x1xf32>
    %cst_78 = arith.constant 1.000000e+01 : f32
    %355 = vector.broadcast %cst_78 : f32 to vector<1x1xf32>
    %356 = arith.mulf %354, %355 : vector<1x1xf32>
    %357 = math.exp %356 : vector<1x1xf32>
    %358 = arith.addf %299, %357 : vector<1x1xf32>
    %359 = arith.addf %314, %357 : vector<1x1xf32>
    %360 = vector.extract_strided_slice %6 {offsets = [4, 0, 0], sizes = [1, 32, 1], strides = [1, 1, 1]} : vector<8x32x1xf32> to vector<1x32x1xf32>
    %361 = vector.shape_cast %360 : vector<1x32x1xf32> to vector<32x1xf32>
    %362 = vector.extract_strided_slice %6 {offsets = [6, 0, 0], sizes = [1, 32, 1], strides = [1, 1, 1]} : vector<8x32x1xf32> to vector<1x32x1xf32>
    %363 = vector.shape_cast %362 : vector<1x32x1xf32> to vector<32x1xf32>
    %364 = arith.mulf %361, %363 : vector<32x1xf32>
    %cst_79 = arith.constant dense<0.000000e+00> : vector<1xf32>
    %365 = vector.multi_reduction <add>, %364, %cst_79 [0] : vector<32x1xf32> to vector<1xf32>
    %366 = vector.shape_cast %365 : vector<1xf32> to vector<1x1xf32>
    %cst_80 = arith.constant -0.142857149 : f32
    %367 = vector.broadcast %cst_80 : f32 to vector<1x1xf32>
    %368 = arith.subf %366, %367 : vector<1x1xf32>
    %369 = arith.mulf %368, %368 : vector<1x1xf32>
    %cst_81 = arith.constant 1.000000e+01 : f32
    %370 = vector.broadcast %cst_81 : f32 to vector<1x1xf32>
    %371 = arith.mulf %369, %370 : vector<1x1xf32>
    %372 = math.exp %371 : vector<1x1xf32>
    %373 = arith.addf %358, %372 : vector<1x1xf32>
    %374 = arith.addf %329, %372 : vector<1x1xf32>
    %375 = vector.extract_strided_slice %6 {offsets = [4, 0, 0], sizes = [1, 32, 1], strides = [1, 1, 1]} : vector<8x32x1xf32> to vector<1x32x1xf32>
    %376 = vector.shape_cast %375 : vector<1x32x1xf32> to vector<32x1xf32>
    %377 = vector.extract_strided_slice %6 {offsets = [7, 0, 0], sizes = [1, 32, 1], strides = [1, 1, 1]} : vector<8x32x1xf32> to vector<1x32x1xf32>
    %378 = vector.shape_cast %377 : vector<1x32x1xf32> to vector<32x1xf32>
    %379 = arith.mulf %376, %378 : vector<32x1xf32>
    %cst_82 = arith.constant dense<0.000000e+00> : vector<1xf32>
    %380 = vector.multi_reduction <add>, %379, %cst_82 [0] : vector<32x1xf32> to vector<1xf32>
    %381 = vector.shape_cast %380 : vector<1xf32> to vector<1x1xf32>
    %cst_83 = arith.constant -0.142857149 : f32
    %382 = vector.broadcast %cst_83 : f32 to vector<1x1xf32>
    %383 = arith.subf %381, %382 : vector<1x1xf32>
    %384 = arith.mulf %383, %383 : vector<1x1xf32>
    %cst_84 = arith.constant 1.000000e+01 : f32
    %385 = vector.broadcast %cst_84 : f32 to vector<1x1xf32>
    %386 = arith.mulf %384, %385 : vector<1x1xf32>
    %387 = math.exp %386 : vector<1x1xf32>
    %388 = arith.addf %373, %387 : vector<1x1xf32>
    %389 = arith.addf %344, %387 : vector<1x1xf32>
    %390 = vector.extract_strided_slice %6 {offsets = [5, 0, 0], sizes = [1, 32, 1], strides = [1, 1, 1]} : vector<8x32x1xf32> to vector<1x32x1xf32>
    %391 = vector.shape_cast %390 : vector<1x32x1xf32> to vector<32x1xf32>
    %392 = vector.extract_strided_slice %6 {offsets = [6, 0, 0], sizes = [1, 32, 1], strides = [1, 1, 1]} : vector<8x32x1xf32> to vector<1x32x1xf32>
    %393 = vector.shape_cast %392 : vector<1x32x1xf32> to vector<32x1xf32>
    %394 = arith.mulf %391, %393 : vector<32x1xf32>
    %cst_85 = arith.constant dense<0.000000e+00> : vector<1xf32>
    %395 = vector.multi_reduction <add>, %394, %cst_85 [0] : vector<32x1xf32> to vector<1xf32>
    %396 = vector.shape_cast %395 : vector<1xf32> to vector<1x1xf32>
    %cst_86 = arith.constant -0.142857149 : f32
    %397 = vector.broadcast %cst_86 : f32 to vector<1x1xf32>
    %398 = arith.subf %396, %397 : vector<1x1xf32>
    %399 = arith.mulf %398, %398 : vector<1x1xf32>
    %cst_87 = arith.constant 1.000000e+01 : f32
    %400 = vector.broadcast %cst_87 : f32 to vector<1x1xf32>
    %401 = arith.mulf %399, %400 : vector<1x1xf32>
    %402 = math.exp %401 : vector<1x1xf32>
    %403 = arith.addf %359, %402 : vector<1x1xf32>
    %404 = arith.addf %374, %402 : vector<1x1xf32>
    %405 = vector.extract_strided_slice %6 {offsets = [5, 0, 0], sizes = [1, 32, 1], strides = [1, 1, 1]} : vector<8x32x1xf32> to vector<1x32x1xf32>
    %406 = vector.shape_cast %405 : vector<1x32x1xf32> to vector<32x1xf32>
    %407 = vector.extract_strided_slice %6 {offsets = [7, 0, 0], sizes = [1, 32, 1], strides = [1, 1, 1]} : vector<8x32x1xf32> to vector<1x32x1xf32>
    %408 = vector.shape_cast %407 : vector<1x32x1xf32> to vector<32x1xf32>
    %409 = arith.mulf %406, %408 : vector<32x1xf32>
    %cst_88 = arith.constant dense<0.000000e+00> : vector<1xf32>
    %410 = vector.multi_reduction <add>, %409, %cst_88 [0] : vector<32x1xf32> to vector<1xf32>
    %411 = vector.shape_cast %410 : vector<1xf32> to vector<1x1xf32>
    %cst_89 = arith.constant -0.142857149 : f32
    %412 = vector.broadcast %cst_89 : f32 to vector<1x1xf32>
    %413 = arith.subf %411, %412 : vector<1x1xf32>
    %414 = arith.mulf %413, %413 : vector<1x1xf32>
    %cst_90 = arith.constant 1.000000e+01 : f32
    %415 = vector.broadcast %cst_90 : f32 to vector<1x1xf32>
    %416 = arith.mulf %414, %415 : vector<1x1xf32>
    %417 = math.exp %416 : vector<1x1xf32>
    %418 = arith.addf %403, %417 : vector<1x1xf32>
    %419 = arith.addf %389, %417 : vector<1x1xf32>
    %420 = vector.extract_strided_slice %6 {offsets = [6, 0, 0], sizes = [1, 32, 1], strides = [1, 1, 1]} : vector<8x32x1xf32> to vector<1x32x1xf32>
    %421 = vector.shape_cast %420 : vector<1x32x1xf32> to vector<32x1xf32>
    %422 = vector.extract_strided_slice %6 {offsets = [7, 0, 0], sizes = [1, 32, 1], strides = [1, 1, 1]} : vector<8x32x1xf32> to vector<1x32x1xf32>
    %423 = vector.shape_cast %422 : vector<1x32x1xf32> to vector<32x1xf32>
    %424 = arith.mulf %421, %423 : vector<32x1xf32>
    %cst_91 = arith.constant dense<0.000000e+00> : vector<1xf32>
    %425 = vector.multi_reduction <add>, %424, %cst_91 [0] : vector<32x1xf32> to vector<1xf32>
    %426 = vector.shape_cast %425 : vector<1xf32> to vector<1x1xf32>
    %cst_92 = arith.constant -0.142857149 : f32
    %427 = vector.broadcast %cst_92 : f32 to vector<1x1xf32>
    %428 = arith.subf %426, %427 : vector<1x1xf32>
    %429 = arith.mulf %428, %428 : vector<1x1xf32>
    %cst_93 = arith.constant 1.000000e+01 : f32
    %430 = vector.broadcast %cst_93 : f32 to vector<1x1xf32>
    %431 = arith.mulf %429, %430 : vector<1x1xf32>
    %432 = math.exp %431 : vector<1x1xf32>
    %433 = arith.addf %404, %432 : vector<1x1xf32>
    %434 = arith.addf %419, %432 : vector<1x1xf32>
    %cst_94 = arith.constant 0.000000e+00 : f32
    %435 = vector.broadcast %cst_94 : f32 to vector<1x1xf32>
    %cst_95 = arith.constant 0.000000e+00 : f32
    %436 = vector.broadcast %cst_95 : f32 to vector<1x1xf32>
    %437 = math.log %118 : vector<1x1xf32>
    %cst_96 = arith.constant 1.9459101 : f32
    %438 = vector.broadcast %cst_96 : f32 to vector<1x1xf32>
    %439 = arith.subf %437, %438 : vector<1x1xf32>
    %440 = arith.cmpf one, %439, %439 : vector<1x1xf32>
    %cst_97 = arith.constant dense<true> : vector<1x1xi1>
    %441 = arith.xori %440, %cst_97 : vector<1x1xi1>
    %cst_98 = arith.constant 0.000000e+00 : f32
    %442 = vector.broadcast %cst_98 : f32 to vector<1x1xf32>
    %443 = arith.select %441, %439, %442 : vector<1x1xi1>, vector<1x1xf32>
    %444 = arith.addf %435, %443 : vector<1x1xf32>
    %445 = arith.extui %441 : vector<1x1xi1> to vector<1x1xi32>
    %446 = arith.sitofp %445 : vector<1x1xi32> to vector<1x1xf32>
    %447 = arith.addf %436, %446 : vector<1x1xf32>
    %448 = math.log %208 : vector<1x1xf32>
    %cst_99 = arith.constant 1.9459101 : f32
    %449 = vector.broadcast %cst_99 : f32 to vector<1x1xf32>
    %450 = arith.subf %448, %449 : vector<1x1xf32>
    %451 = arith.cmpf one, %450, %450 : vector<1x1xf32>
    %cst_100 = arith.constant dense<true> : vector<1x1xi1>
    %452 = arith.xori %451, %cst_100 : vector<1x1xi1>
    %cst_101 = arith.constant 0.000000e+00 : f32
    %453 = vector.broadcast %cst_101 : f32 to vector<1x1xf32>
    %454 = arith.select %452, %450, %453 : vector<1x1xi1>, vector<1x1xf32>
    %455 = arith.addf %444, %454 : vector<1x1xf32>
    %456 = arith.extui %452 : vector<1x1xi1> to vector<1x1xi32>
    %457 = arith.sitofp %456 : vector<1x1xi32> to vector<1x1xf32>
    %458 = arith.addf %447, %457 : vector<1x1xf32>
    %459 = math.log %283 : vector<1x1xf32>
    %cst_102 = arith.constant 1.9459101 : f32
    %460 = vector.broadcast %cst_102 : f32 to vector<1x1xf32>
    %461 = arith.subf %459, %460 : vector<1x1xf32>
    %462 = arith.cmpf one, %461, %461 : vector<1x1xf32>
    %cst_103 = arith.constant dense<true> : vector<1x1xi1>
    %463 = arith.xori %462, %cst_103 : vector<1x1xi1>
    %cst_104 = arith.constant 0.000000e+00 : f32
    %464 = vector.broadcast %cst_104 : f32 to vector<1x1xf32>
    %465 = arith.select %463, %461, %464 : vector<1x1xi1>, vector<1x1xf32>
    %466 = arith.addf %455, %465 : vector<1x1xf32>
    %467 = arith.extui %463 : vector<1x1xi1> to vector<1x1xi32>
    %468 = arith.sitofp %467 : vector<1x1xi32> to vector<1x1xf32>
    %469 = arith.addf %458, %468 : vector<1x1xf32>
    %470 = math.log %343 : vector<1x1xf32>
    %cst_105 = arith.constant 1.9459101 : f32
    %471 = vector.broadcast %cst_105 : f32 to vector<1x1xf32>
    %472 = arith.subf %470, %471 : vector<1x1xf32>
    %473 = arith.cmpf one, %472, %472 : vector<1x1xf32>
    %cst_106 = arith.constant dense<true> : vector<1x1xi1>
    %474 = arith.xori %473, %cst_106 : vector<1x1xi1>
    %cst_107 = arith.constant 0.000000e+00 : f32
    %475 = vector.broadcast %cst_107 : f32 to vector<1x1xf32>
    %476 = arith.select %474, %472, %475 : vector<1x1xi1>, vector<1x1xf32>
    %477 = arith.addf %466, %476 : vector<1x1xf32>
    %478 = arith.extui %474 : vector<1x1xi1> to vector<1x1xi32>
    %479 = arith.sitofp %478 : vector<1x1xi32> to vector<1x1xf32>
    %480 = arith.addf %469, %479 : vector<1x1xf32>
    %481 = math.log %388 : vector<1x1xf32>
    %cst_108 = arith.constant 1.9459101 : f32
    %482 = vector.broadcast %cst_108 : f32 to vector<1x1xf32>
    %483 = arith.subf %481, %482 : vector<1x1xf32>
    %484 = arith.cmpf one, %483, %483 : vector<1x1xf32>
    %cst_109 = arith.constant dense<true> : vector<1x1xi1>
    %485 = arith.xori %484, %cst_109 : vector<1x1xi1>
    %cst_110 = arith.constant 0.000000e+00 : f32
    %486 = vector.broadcast %cst_110 : f32 to vector<1x1xf32>
    %487 = arith.select %485, %483, %486 : vector<1x1xi1>, vector<1x1xf32>
    %488 = arith.addf %477, %487 : vector<1x1xf32>
    %489 = arith.extui %485 : vector<1x1xi1> to vector<1x1xi32>
    %490 = arith.sitofp %489 : vector<1x1xi32> to vector<1x1xf32>
    %491 = arith.addf %480, %490 : vector<1x1xf32>
    %492 = math.log %418 : vector<1x1xf32>
    %cst_111 = arith.constant 1.9459101 : f32
    %493 = vector.broadcast %cst_111 : f32 to vector<1x1xf32>
    %494 = arith.subf %492, %493 : vector<1x1xf32>
    %495 = arith.cmpf one, %494, %494 : vector<1x1xf32>
    %cst_112 = arith.constant dense<true> : vector<1x1xi1>
    %496 = arith.xori %495, %cst_112 : vector<1x1xi1>
    %cst_113 = arith.constant 0.000000e+00 : f32
    %497 = vector.broadcast %cst_113 : f32 to vector<1x1xf32>
    %498 = arith.select %496, %494, %497 : vector<1x1xi1>, vector<1x1xf32>
    %499 = arith.addf %488, %498 : vector<1x1xf32>
    %500 = arith.extui %496 : vector<1x1xi1> to vector<1x1xi32>
    %501 = arith.sitofp %500 : vector<1x1xi32> to vector<1x1xf32>
    %502 = arith.addf %491, %501 : vector<1x1xf32>
    %503 = math.log %433 : vector<1x1xf32>
    %cst_114 = arith.constant 1.9459101 : f32
    %504 = vector.broadcast %cst_114 : f32 to vector<1x1xf32>
    %505 = arith.subf %503, %504 : vector<1x1xf32>
    %506 = arith.cmpf one, %505, %505 : vector<1x1xf32>
    %cst_115 = arith.constant dense<true> : vector<1x1xi1>
    %507 = arith.xori %506, %cst_115 : vector<1x1xi1>
    %cst_116 = arith.constant 0.000000e+00 : f32
    %508 = vector.broadcast %cst_116 : f32 to vector<1x1xf32>
    %509 = arith.select %507, %505, %508 : vector<1x1xi1>, vector<1x1xf32>
    %510 = arith.addf %499, %509 : vector<1x1xf32>
    %511 = arith.extui %507 : vector<1x1xi1> to vector<1x1xi32>
    %512 = arith.sitofp %511 : vector<1x1xi32> to vector<1x1xf32>
    %513 = arith.addf %502, %512 : vector<1x1xf32>
    %514 = math.log %434 : vector<1x1xf32>
    %cst_117 = arith.constant 1.9459101 : f32
    %515 = vector.broadcast %cst_117 : f32 to vector<1x1xf32>
    %516 = arith.subf %514, %515 : vector<1x1xf32>
    %517 = arith.cmpf one, %516, %516 : vector<1x1xf32>
    %cst_118 = arith.constant dense<true> : vector<1x1xi1>
    %518 = arith.xori %517, %cst_118 : vector<1x1xi1>
    %cst_119 = arith.constant 0.000000e+00 : f32
    %519 = vector.broadcast %cst_119 : f32 to vector<1x1xf32>
    %520 = arith.select %518, %516, %519 : vector<1x1xi1>, vector<1x1xf32>
    %521 = arith.addf %510, %520 : vector<1x1xf32>
    %522 = arith.extui %518 : vector<1x1xi1> to vector<1x1xi32>
    %523 = arith.sitofp %522 : vector<1x1xi32> to vector<1x1xf32>
    %524 = arith.addf %513, %523 : vector<1x1xf32>
    %525 = arith.divf %521, %524 : vector<1x1xf32>
    %cst_120 = arith.constant 1.000000e+00 : f32
    %526 = vector.broadcast %cst_120 : f32 to vector<1x1xf32>
    %527 = arith.mulf %526, %525 : vector<1x1xf32>
    %c0_121 = arith.constant 0 : index
    %c0_122 = arith.constant 0 : index
    %528 = vector.load %arg2[%c0_121, %c0_122] : memref<1x1xf32, #tpu.memory_space<vmem>>, vector<1x1xf32>
    tpu.vector_store %arg2[%c0_121, %c0_122], %527 {strides = array<i32>} : memref<1x1xf32, #tpu.memory_space<vmem>>, vector<1x1xf32>,
    return
  }
  func.func @transform_0(%arg0: i32) -> (i32, i32, i32) {
    %c0_i32 = arith.constant 0 : i32
    %c0_i32_0 = arith.constant 0 : i32
    %c0_i32_1 = arith.constant 0 : i32
    return %c0_i32, %c0_i32_0, %arg0 : i32, i32, i32
  }
  func.func @transform_1(%arg0: i32) -> (i32, i32) {
    %c0_i32 = arith.constant 0 : i32
    %c0_i32_0 = arith.constant 0 : i32
    return %c0_i32, %arg0 : i32, i32
  }
}

</mosaic_0001>

<bundles_post_ra>
// kernel: tpu_custom_call.1
= control target key start
LH: loop header
LB: loop body
LE: loop exit
PB: predicated region body
PF: predicated region fallthrough
CT: control target
= control target key end

     0   :  { %6 = vsyncpa [#allocation3], 0  ;;  %vm73_vm0 = vcmask 7168   ;;  %vm1146_vm3 = vmmov 1   ;;  %s2000_s0 = inlined_call_operand.vmem [shape: f32[8,32,1], index: 0, kind: input, shape index: {}]   ;;  %s2001_s1 = inlined_call_operand.hbm [shape: f32[1,1], index: 1, kind: output, shape index: {}]  }
   0x1   :  { %v1162_v0 = vld [vmem:[%s2000_s0] sm:$0xff]  ;;  %v1167_v1 = vld [vmem:[%s2000_s0 + $0x8] sm:$0xff]  ;;  %v1172_v2 = vld [vmem:[%s2000_s0 + $0x10] sm:$0xff] }
   0x2   :  { %v1177_v3 = vld [vmem:[%s2000_s0 + $0x18] sm:$0xff]  ;;  %v1182_v4 = vld [vmem:[%s2000_s0 + $0x20] sm:$0xff]  ;;  %v41_v5 = vmul.f32 %v1162_v0, %v1162_v0  ;;  %v42_v6 = vmul.f32 %v1167_v1, %v1167_v1  ;;  %v1191_v7 = vld [vmem:[%s2000_s0 + $0x28] sm:$0xff]  ;;  %v43_v10 = vmul.f32 %v1172_v2, %v1172_v2 }
   0x3   :  { %v1196_v8 = vld [vmem:[%s2000_s0 + $0x30] sm:$0xff]  ;;  %v1201_v9 = vld [vmem:[%s2000_s0 + $0x38] sm:$0xff]  ;;  %v44_v11 = vmul.f32 %v1177_v3, %v1177_v3  ;;  %v45_v12 = vmul.f32 %v1182_v4, %v1182_v4  ;;  %v1212_v13 = vld [vmem:[%s2000_s0 + $0x40] sm:$0xff]  ;;  %v46_v16 = vmul.f32 %v1191_v7, %v1191_v7 }
   0x4   :  { %v1217_v14 = vld [vmem:[%s2000_s0 + $0x48] sm:$0xff]  ;;  %v1222_v15 = vld [vmem:[%s2000_s0 + $0x50] sm:$0xff]  ;;  %v47_v17 = vmul.f32 %v1196_v8, %v1196_v8  ;;  %v48_v18 = vmul.f32 %v1201_v9, %v1201_v9  ;;  %v74_v19 = vsel %vm73_vm0, %v41_v5, 0.0  ;;  %v1234_v20 = vld [vmem:[%s2000_s0 + $0x58] sm:$0xff]  ;;  %v49_v23 = vmul.f32 %v1212_v13, %v1212_v13 }
   0x5   :  { %v1239_v21 = vld [vmem:[%s2000_s0 + $0x60] sm:$0xff]  ;;  %v1244_v22 = vld [vmem:[%s2000_s0 + $0x68] sm:$0xff]  ;;  %v50_v24 = vmul.f32 %v1217_v14, %v1217_v14  ;;  %v51_v25 = vmul.f32 %v1222_v15, %v1222_v15  ;;  %v75_v26 = vsel %vm73_vm0, %v42_v6, 0.0  ;;  %v1256_v27 = vld [vmem:[%s2000_s0 + $0x70] sm:$0xff]  ;;  %v52_v30 = vmul.f32 %v1234_v20, %v1234_v20 }
   0x6   :  { %v1261_v28 = vld [vmem:[%s2000_s0 + $0x78] sm:$0xff]  ;;  %v1266_v29 = vld [vmem:[%s2000_s0 + $0x80] sm:$0xff]  ;;  %v53_v31 = vmul.f32 %v1239_v21, %v1239_v21  ;;  %v54_v32 = vmul.f32 %v1244_v22, %v1244_v22  ;;  %v76_v33 = vadd.f32 %v75_v26, %v74_v19  ;;  %v1277_v34 = vld [vmem:[%s2000_s0 + $0x88] sm:$0xff]  ;;  %v55_v37 = vmul.f32 %v1256_v27, %v1256_v27 }
   0x7   :  { %v1282_v35 = vld [vmem:[%s2000_s0 + $0x90] sm:$0xff]  ;;  %v1287_v36 = vld [vmem:[%s2000_s0 + $0x98] sm:$0xff]  ;;  %v56_v38 = vmul.f32 %v1261_v28, %v1261_v28  ;;  %v57_v39 = vmul.f32 %v1266_v29, %v1266_v29  ;;  %v77_v40 = vsel %vm73_vm0, %v43_v10, 0.0  ;;  %v1299_v41 = vld [vmem:[%s2000_s0 + $0xa0] sm:$0xff]  ;;  %v58_v44 = vmul.f32 %v1277_v34, %v1277_v34 }
   0x8   :  { %2014 = vst [vmem:[#allocation5_spill] sm:$0xff] %v1299_v41  ;;  %v1304_v42 = vld [vmem:[%s2000_s0 + $0xa8] sm:$0xff]  ;;  %v1309_v43 = vld [vmem:[%s2000_s0 + $0xb0] sm:$0xff]  ;;  %v59_v45 = vmul.f32 %v1282_v35, %v1282_v35  ;;  %v60_v46 = vmul.f32 %v1287_v36, %v1287_v36  ;;  %v78_v47 = vadd.f32 %v77_v40, %v76_v33  ;;  %v1320_v48 = vld [vmem:[%s2000_s0 + $0xb8] sm:$0xff]  ;;  %v61_v51 = vmul.f32 %v1299_v41, %v1299_v41 }
   0x9   :  { %2015 = vst [vmem:[#allocation6_spill] sm:$0xff] %v1304_v42  ;;  %2016 = vst [vmem:[#allocation7_spill] sm:$0xff] %v1309_v43  ;;  %v1325_v49 = vld [vmem:[%s2000_s0 + $0xc0] sm:$0xff]  ;;  %v1330_v50 = vld [vmem:[%s2000_s0 + $0xc8] sm:$0xff]  ;;  %v62_v52 = vmul.f32 %v1304_v42, %v1304_v42  ;;  %v63_v53 = vmul.f32 %v1309_v43, %v1309_v43  ;;  %v79_v54 = vsel %vm73_vm0, %v44_v11, 0.0  ;;  %v64_v58 = vmul.f32 %v1320_v48, %v1320_v48 }
   0xa   :  { %2017 = vst [vmem:[#allocation8_spill] sm:$0xff] %v1320_v48  ;;  %2018 = vst [vmem:[#allocation9_spill] sm:$0xff] %v1325_v49  ;;  %v1342_v55 = vld [vmem:[%s2000_s0 + $0xd0] sm:$0xff]  ;;  %v1347_v56 = vld [vmem:[%s2000_s0 + $0xd8] sm:$0xff]  ;;  %v65_v59 = vmul.f32 %v1325_v49, %v1325_v49  ;;  %v66_v60 = vmul.f32 %v1330_v50, %v1330_v50  ;;  %v80_v61 = vadd.f32 %v79_v54, %v78_v47  ;;  %v87_v19 = vsel %vm73_vm0, %v45_v12, 0.0 }
   0xb   :  { %2019 = vst [vmem:[#allocation10_spill] sm:$0xff] %v1330_v50  ;;  %2020 = vst [vmem:[#allocation11_spill] sm:$0xff] %v1342_v55  ;;  %v1352_v57 = vld [vmem:[%s2000_s0 + $0xe0] sm:$0xff]  ;;  %v1363_v62 = vld [vmem:[%s2000_s0 + $0xe8] sm:$0xff]  ;;  %v67_v6 = vmul.f32 %v1342_v55, %v1342_v55  ;;  %v68_v10 = vmul.f32 %v1347_v56, %v1347_v56  ;;  %v88_v54 = vsel %vm73_vm0, %v46_v16, 0.0  ;;  %v100_v12 = vsel %vm73_vm0, %v49_v23, 0.0 }
   0xc   :  { %2021 = vst [vmem:[#allocation12_spill] sm:$0xff] %v1347_v56  ;;  %2022 = vst [vmem:[#allocation13_spill] sm:$0xff] %v1352_v57  ;;  %v1368_v63 = vld [vmem:[%s2000_s0 + $0xf0] sm:$0xff]  ;;  %v1373_v5 = vld [vmem:[%s2000_s0 + $0xf8] sm:$0xff]  ;;  %v1381_v11 = vmul.f32 %v1352_v57, %v1352_v57  ;;  %v1386_v26 = vmul.f32 %v1363_v62, %v1363_v62  ;;  %v81_v47 = vrot.slane %v80_v61, 4  ;;  %v90_v57 = vsel %vm73_vm0, %v47_v17, 0.0 }
   0xd   :  { %2023 = vst [vmem:[#allocation14_spill] sm:$0xff] %v1363_v62  ;;  %2024 = vst [vmem:[#allocation15_spill] sm:$0xff] %v1368_v63  ;;  %v1390_v33 = vmul.f32 %v1368_v63, %v1368_v63  ;;  %v1394_v40 = vmul.f32 %v1373_v5, %v1373_v5  ;;  %v92_v56 = vsel %vm73_vm0, %v48_v18, 0.0  ;;  %v89_v62 = vadd.f32 %v88_v54, %v87_v19  ;;  %s1148_s0 = smov [#allocation2]  }
   0xe   :  { %2025 = vst [vmem:[#allocation16_spill] sm:$0xff] %v1373_v5  ;;  %v82_v55 = vadd.f32 %v81_v47, %v80_v61  ;;  %v101_v50 = vsel %vm73_vm0, %v50_v24, 0.0  ;;  %v103_v63 = vsel %vm73_vm0, %v51_v25, 0.0  ;;  %v105_v48 = vsel %vm73_vm0, %v52_v30, 0.0  ;;  %s979_s12 = sshll.u32 %s1148_s0, 4  ;;  %s980_s12 = int_to_ptr.vmem [resolvable:$true] %s979_s12 }
   0xf   :  { %v102_v49 = vadd.f32 %v101_v50, %v100_v12  ;;  %v113_v5 = vsel %vm73_vm0, %v53_v31, 0.0  ;;  %v114_v43 = vsel %vm73_vm0, %v54_v32, 0.0  ;;  %v91_v42 = vadd.f32 %v90_v57, %v89_v62  ;;  %s1124_s13 = scalar_lea.vmem %s980_s12, 16  ;;  %s1128_s14 = scalar_lea.vmem %s980_s12, 32 }
  0x10   :  { %v83_v16 = vrot.slane %v82_v55, 2  ;;  %v115_v17 = vadd.f32 %v114_v43, %v113_v5  ;;  %v116_v18 = vsel %vm73_vm0, %v55_v37, 0.0  ;;  %v118_v23 = vsel %vm73_vm0, %v56_v38, 0.0  ;;  %p1125_p0 = scmp.ne.s32.totalorder %s980_s12, %s1124_s13  ;;  %p1129_p1 = scmp.lt.s32.totalorder %s980_s12, %s980_s12 }
  0x11   :  { %v104_v41 = vadd.f32 %v103_v63, %v102_v49  ;;  %v126_v61 = vsel %vm73_vm0, %v57_v39, 0.0  ;;  %v127_v24 = vsel %vm73_vm0, %v58_v44, 0.0  ;;  %v93_v50 = vadd.f32 %v92_v56, %v91_v42  ;;  %p1130_p2 = scmp.lt.s32.totalorder %s1128_s14, %s1124_s13 }
  0x12   :  { %v84_v25 = vadd.f32 %v83_v16, %v82_v55  ;;  %v117_v19 = vadd.f32 %v116_v18, %v115_v17  ;;  %v128_v30 = vadd.f32 %v127_v24, %v126_v61  ;;  %v129_v31 = vsel %vm73_vm0, %v59_v45, 0.0 }
  0x13   :  { %v106_v47 = vadd.f32 %v105_v48, %v104_v41  ;;  %v131_v32 = vsel %vm73_vm0, %v60_v46, 0.0  ;;  %v139_v43 = vsel %vm73_vm0, %v61_v51, 0.0  ;;  %v94_v37 = vrot.slane %v93_v50, 4  ;;  %p1131_p3 = por %p1130_p2, %p1129_p1 }
  0x14   :  { %v85_v57 = vrot.slane %v84_v25, 1  ;;  %v119_v49 = vadd.f32 %v118_v23, %v117_v19  ;;  %v130_v62 = vadd.f32 %v129_v31, %v128_v30  ;;  %v140_v39 = vsel %vm73_vm0, %v62_v52, 0.0 }
  0x15   :  { %v107_v38 = vrot.slane %v106_v47, 4  ;;  %v142_v44 = vsel %vm73_vm0, %v63_v53, 0.0  ;;  %v144_v42 = vsel %vm73_vm0, %v64_v58, 0.0  ;;  %v95_v56 = vadd.f32 %v94_v37, %v93_v50  ;;  %p1132_p4 = pnand %p1131_p3, %p1125_p0 }
  0x16   :  { %v86_v55 = vadd.f32 %v85_v57, %v84_v25  ;;  %v120_v41 = vrot.slane %v119_v49, 4  ;;  %v132_v48 = vadd.f32 %v131_v32, %v130_v62  ;;  %v141_v63 = vadd.f32 %v140_v39, %v139_v43 }
  0x17   :  { %v108_v45 = vadd.f32 %v107_v38, %v106_v47  ;;  %v152_v46 = vsel %vm73_vm0, %v65_v59, 0.0  ;;  %v153_v51 = vsel %vm73_vm0, %v66_v60, 0.0  ;;  %v96_v5 = vrot.slane %v95_v56, 2 }
  0x18   :  { %v121_v54 = vadd.f32 %v120_v41, %v119_v49  ;;  %v133_v12 = vrot.slane %v132_v48, 4  ;;  %v154_v16 = vadd.f32 %v153_v51, %v152_v46  ;;  %v143_v52 = vadd.f32 %v142_v44, %v141_v63 }
  0x19   :  { %v109_v17 = vrot.slane %v108_v45, 2  ;;  %v155_v53 = vsel %vm73_vm0, %v67_v6, 0.0  ;;  %v157_v58 = vsel %vm73_vm0, %v68_v10, 0.0  ;;  %v97_v18 = vadd.f32 %v96_v5, %v95_v56 }
  0x1a   :  { %v122_v23 = vrot.slane %v121_v54, 2  ;;  %v134_v61 = vadd.f32 %v133_v12, %v132_v48  ;;  %v156_v24 = vadd.f32 %v155_v53, %v154_v16  ;;  %v145_v50 = vadd.f32 %v144_v42, %v143_v52 }
  0x1b   :  { %v110_v25 = vadd.f32 %v109_v17, %v108_v45  ;;  %v165_v59 = vsel %vm73_vm0, %v1381_v11, 0.0  ;;  %v166_v60 = vsel %vm73_vm0, %v1386_v26, 0.0  ;;  %v98_v19 = vrot.slane %v97_v18, 1 }
  0x1c   :  { %v123_v30 = vadd.f32 %v122_v23, %v121_v54  ;;  %v135_v47 = vrot.slane %v134_v61, 2  ;;  %v158_v31 = vadd.f32 %v157_v58, %v156_v24  ;;  %v146_v6 = vrot.slane %v145_v50, 4 }
  0x1d   :  { %v111_v32 = vrot.slane %v110_v25, 1  ;;  %v167_v43 = vadd.f32 %v166_v60, %v165_v59  ;;  %v168_v10 = vsel %vm73_vm0, %v1390_v33, 0.0  ;;  %v99_v57 = vadd.f32 %v98_v19, %v97_v18 }
  0x1e   :  { %v124_v37 = vrot.slane %v123_v30, 1  ;;  %v136_v49 = vadd.f32 %v135_v47, %v134_v61  ;;  %v159_v62 = vrot.slane %v158_v31, 4  ;;  %v147_v39 = vadd.f32 %v146_v6, %v145_v50 }
  0x1f   :  { %v112_v38 = vadd.f32 %v111_v32, %v110_v25  ;;  %v169_v11 = vadd.f32 %v168_v10, %v167_v43  ;;  %v170_v26 = vsel %vm73_vm0, %v1394_v40, 0.0  ;;  %1034 = vrsqrt.f32 %v86_v55 }
  0x20   :  { %v125_v44 = vadd.f32 %v124_v37, %v123_v30  ;;  %v137_v42 = vrot.slane %v136_v49, 1  ;;  %v160_v56 = vadd.f32 %v159_v62, %v158_v31  ;;  %v148_v41 = vrot.slane %v147_v39, 2 }
  0x21   :  { %v171_v48 = vadd.f32 %v170_v26, %v169_v11  ;;  %1036 = vrsqrt.f32 %v99_v57  ;;  %v2026_v26 = vld [vmem:[#allocation5_spill] sm:$0xff] }
  0x22   :  { %v138_v45 = vadd.f32 %v137_v42, %v136_v49  ;;  %v161_v63 = vrot.slane %v160_v56, 2  ;;  %1038 = vrsqrt.f32 %v112_v38  ;;  %v149_v33 = vadd.f32 %v148_v41, %v147_v39  ;;  %v2027_v42 = vld [vmem:[#allocation6_spill] sm:$0xff]  ;;  %v2028_v41 = vld [vmem:[#allocation7_spill] sm:$0xff] }
  0x23   :  { %v172_v46 = vrot.slane %v171_v48, 4  ;;  %1040 = vrsqrt.f32 %v125_v44 }
  0x24   :  { %v162_v51 = vadd.f32 %v161_v63, %v160_v56  ;;  %1042 = vrsqrt.f32 %v138_v45  ;;  %v150_v5 = vrot.slane %v149_v33, 1  ;;  %v2029_v45 = vld [vmem:[#allocation8_spill] sm:$0xff] }
  0x25   :  { %v173_v54 = vadd.f32 %v172_v46, %v171_v48 }
  0x26   :  { %v163_v12 = vrot.slane %v162_v51, 1  ;;  %v151_v16 = vadd.f32 %v150_v5, %v149_v33 }
  0x27   :  { %v174_v40 = vrot.slane %v173_v54, 2 }
  0x28   :  { %v164_v17 = vadd.f32 %v163_v12, %v162_v51  ;;  %1044 = vrsqrt.f32 %v151_v16 }
  0x29   :  { %v175_v52 = vadd.f32 %v174_v40, %v173_v54 }
  0x2a   :  { %1046 = vrsqrt.f32 %v164_v17 }
  0x2b   :  { %v176_v55 = vrot.slane %v175_v52, 1 }
  0x2c   :  { %v1035_v53 = vpop.eup %1034 }
  0x2d   :  { %v177_v18 = vadd.f32 %v176_v55, %v175_v52  ;;  %v1428_v23 = vmul.f32 %v1035_v53, %v1162_v0  ;;  %v1431_v61 = vmul.f32 %v1035_v53, %v1167_v1  ;;  %v1434_v25 = vmul.f32 %v1035_v53, %v1172_v2  ;;  %v2030_v55 = vld [vmem:[#allocation9_spill] sm:$0xff] }
  0x2e   :  { %v1037_v58 = vpop.eup %1036  ;;  %v1446_v0 = vmul.f32 %v1035_v53, %v1177_v3 }
  0x2f   :  { %v1039_v24 = vpop.eup %1038  ;;  %v1437_v50 = vmul.f32 %v1037_v58, %v1182_v4  ;;  %v1440_v59 = vmul.f32 %v1037_v58, %v1191_v7  ;;  %v1443_v60 = vmul.f32 %v1037_v58, %v1196_v8  ;;  %v1449_v1 = vmul.f32 %v1037_v58, %v1201_v9  ;;  %v2031_v58 = vld [vmem:[#allocation10_spill] sm:$0xff] }
  0x30   :  { %v1041_v19 = vpop.eup %1040  ;;  %v1452_v30 = vmul.f32 %v1039_v24, %v1212_v13  ;;  %v1455_v2 = vmul.f32 %v1039_v24, %v1217_v14  ;;  %v1458_v7 = vmul.f32 %v1039_v24, %v1222_v15  ;;  %v1461_v8 = vmul.f32 %v1039_v24, %v1234_v20 }
  0x31   :  { %v1043_v4 = vpop.eup %1042  ;;  %1048 = vrsqrt.f32 %v177_v18  ;;  %v1464_v3 = vmul.f32 %v1041_v19, %v1239_v21  ;;  %v1467_v9 = vmul.f32 %v1041_v19, %v1244_v22  ;;  %v1470_v13 = vmul.f32 %v1041_v19, %v1256_v27 }
  0x32   :  { %v1473_v14 = vmul.f32 %v1041_v19, %v1261_v28  ;;  %v218_v15 = vmul.f32 %v1437_v50, %v1428_v23  ;;  %v219_v20 = vmul.f32 %v1440_v59, %v1431_v61  ;;  %v220_v47 = vmul.f32 %v1443_v60, %v1434_v25 }
  0x33   :  { %v1482_v21 = vmul.f32 %v1043_v4, %v1266_v29  ;;  %v221_v22 = vmul.f32 %v1449_v1, %v1446_v0  ;;  %v241_v27 = vmul.f32 %v1452_v30, %v1428_v23  ;;  %v242_v28 = vmul.f32 %v1455_v2, %v1431_v61 }
  0x34   :  { %v222_v31 = vsel %vm73_vm0, %v218_v15, 0.0  ;;  %v223_v32 = vsel %vm73_vm0, %v219_v20, 0.0  ;;  %v243_v6 = vmul.f32 %v1458_v7, %v1434_v25  ;;  %v244_v29 = vmul.f32 %v1461_v8, %v1446_v0  ;;  %v2033_v20 = vld [vmem:[#allocation12_spill] sm:$0xff] }
  0x35   :  { %v1045_v43 = vpop.eup %1044  ;;  %v224_v10 = vadd.f32 %v223_v32, %v222_v31  ;;  %v225_v57 = vsel %vm73_vm0, %v220_v47, 0.0  ;;  %v245_v37 = vsel %vm73_vm0, %v241_v27, 0.0  ;;  %v246_v49 = vsel %vm73_vm0, %v242_v28, 0.0 }
  0x36   :  { %v1500_v62 = vmul.f32 %v1043_v4, %v1277_v34  ;;  %v1503_v38 = vmul.f32 %v1043_v4, %v1282_v35  ;;  %v1506_v39 = vmul.f32 %v1043_v4, %v1287_v36  ;;  %v227_v11 = vsel %vm73_vm0, %v221_v22, 0.0  ;;  %v2032_v4 = vld [vmem:[#allocation11_spill] sm:$0xff] }
  0x37   :  { %v1510_v44 = vmul.f32 %v1045_v43, %v2026_v26  ;;  %v1513_v56 = vmul.f32 %v1045_v43, %v2027_v42  ;;  %v1516_v48 = vmul.f32 %v1045_v43, %v2028_v41  ;;  %v1519_v34 = vmul.f32 %v1045_v43, %v2029_v45  ;;  %v1047_v63 = vpop.eup %1046 }
  0x38   :  { %v226_v35 = vadd.f32 %v225_v57, %v224_v10  ;;  %v247_v33 = vadd.f32 %v246_v49, %v245_v37  ;;  %v248_v36 = vsel %vm73_vm0, %v243_v6, 0.0  ;;  %v250_v46 = vsel %vm73_vm0, %v244_v29, 0.0 }
  0x39   :  { %v265_v51 = vmul.f32 %v1464_v3, %v1428_v23  ;;  %v266_v5 = vmul.f32 %v1467_v9, %v1431_v61  ;;  %v267_v54 = vmul.f32 %v1470_v13, %v1434_v25  ;;  %v268_v12 = vmul.f32 %v1473_v14, %v1446_v0 }
  0x3a   :  { %v228_v16 = vadd.f32 %v227_v11, %v226_v35  ;;  %v249_v40 = vadd.f32 %v248_v36, %v247_v33  ;;  %v289_v17 = vmul.f32 %v1482_v21, %v1428_v23  ;;  %v290_v52 = vmul.f32 %v1500_v62, %v1431_v61 }
  0x3b   :  { %v1536_v53 = vmul.f32 %v1047_v63, %v2030_v55  ;;  %v1539_v18 = vmul.f32 %v1047_v63, %v2031_v58  ;;  %v269_v24 = vsel %vm73_vm0, %v265_v51, 0.0  ;;  %v270_v19 = vsel %vm73_vm0, %v266_v5, 0.0 }
  0x3c   :  { %v1544_v15 = vmul.f32 %v1047_v63, %v2032_v4  ;;  %v1547_v47 = vmul.f32 %v1047_v63, %v2033_v20  ;;  %v272_v22 = vsel %vm73_vm0, %v267_v54, 0.0  ;;  %v274_v27 = vsel %vm73_vm0, %v268_v12, 0.0 }
  0x3d   :  { %v229_v28 = vrot.slane %v228_v16, 4  ;;  %v251_v31 = vadd.f32 %v250_v46, %v249_v40  ;;  %v271_v32 = vadd.f32 %v270_v19, %v269_v24  ;;  %v291_v6 = vmul.f32 %v1503_v38, %v1434_v25 }
  0x3e   :  { %v1049_v29 = vpop.eup %1048  ;;  %v292_v43 = vmul.f32 %v1506_v39, %v1446_v0  ;;  %v293_v10 = vsel %vm73_vm0, %v289_v17, 0.0  ;;  %v294_v57 = vsel %vm73_vm0, %v290_v52, 0.0  ;;  %v313_v37 = vmul.f32 %v1510_v44, %v1428_v23 }
  0x3f   :  { %v230_v49 = vadd.f32 %v229_v28, %v228_v16  ;;  %v252_v11 = vrot.slane %v251_v31, 4  ;;  %v273_v26 = vadd.f32 %v272_v22, %v271_v32  ;;  %v295_v42 = vadd.f32 %v294_v57, %v293_v10  ;;  %v2035_v10 = vld [vmem:[#allocation14_spill] sm:$0xff] }
  0x40   :  { %v296_v41 = vsel %vm73_vm0, %v291_v6, 0.0  ;;  %v298_v45 = vsel %vm73_vm0, %v292_v43, 0.0  ;;  %v314_v63 = vmul.f32 %v1513_v56, %v1431_v61  ;;  %v315_v35 = vmul.f32 %v1516_v48, %v1434_v25 }
  0x41   :  { %v231_v33 = vrot.slane %v230_v49, 2  ;;  %v253_v36 = vadd.f32 %v252_v11, %v251_v31  ;;  %v275_v46 = vadd.f32 %v274_v27, %v273_v26  ;;  %v297_v51 = vadd.f32 %v296_v41, %v295_v42  ;;  %v2034_v31 = vld [vmem:[#allocation13_spill] sm:$0xff] }
  0x42   :  { %v316_v5 = vmul.f32 %v1519_v34, %v1446_v0  ;;  %v317_v54 = vsel %vm73_vm0, %v313_v37, 0.0  ;;  %v318_v12 = vsel %vm73_vm0, %v314_v63, 0.0  ;;  %v320_v16 = vsel %vm73_vm0, %v315_v35, 0.0 }
  0x43   :  { %v232_v40 = vadd.f32 %v231_v33, %v230_v49  ;;  %v254_v17 = vrot.slane %v253_v36, 2  ;;  %v276_v52 = vrot.slane %v275_v46, 4  ;;  %v299_v55 = vadd.f32 %v298_v45, %v297_v51 }
  0x44   :  { %v319_v58 = vadd.f32 %v318_v12, %v317_v54  ;;  %v322_v24 = vsel %vm73_vm0, %v316_v5, 0.0  ;;  %v337_v19 = vmul.f32 %v1536_v53, %v1428_v23  ;;  %v338_v4 = vmul.f32 %v1539_v18, %v1431_v61  ;;  %v2036_v5 = vld [vmem:[#allocation15_spill] sm:$0xff] }
  0x45   :  { %v233_v20 = vrot.slane %v232_v40, 1  ;;  %v255_v22 = vadd.f32 %v254_v17, %v253_v36  ;;  %v277_v27 = vadd.f32 %v276_v52, %v275_v46  ;;  %v300_v28 = vrot.slane %v299_v55, 4 }
  0x46   :  { %v1576_v32 = vmul.f32 %v1049_v29, %v2034_v31  ;;  %v321_v6 = vadd.f32 %v320_v16, %v319_v58  ;;  %v339_v43 = vmul.f32 %v1544_v15, %v1434_v25  ;;  %v1581_v57 = vmul.f32 %v1049_v29, %v2035_v10 }
  0x47   :  { %v234_v37 = vadd.f32 %v233_v20, %v232_v40  ;;  %v256_v49 = vrot.slane %v255_v22, 1  ;;  %v341_v11 = vsel %vm73_vm0, %v337_v19, 0.0  ;;  %v278_v26 = vrot.slane %v277_v27, 2 }
  0x48   :  { %v301_v42 = vadd.f32 %v300_v28, %v299_v55  ;;  %v323_v41 = vadd.f32 %v322_v24, %v321_v6  ;;  %v342_v45 = vsel %vm73_vm0, %v338_v4, 0.0  ;;  %v340_v63 = vmul.f32 %v1547_v47, %v1446_v0  ;;  %v2037_v4 = vld [vmem:[#allocation16_spill] sm:$0xff] }
  0x49   :  { %v344_v35 = vsel %vm73_vm0, %v339_v43, 0.0  ;;  %v987_v33 = vadd.f32 0.14285715, %v234_v37  ;;  %v257_v36 = vadd.f32 %v256_v49, %v255_v22  ;;  %v343_v51 = vadd.f32 %v342_v45, %v341_v11 }
  0x4a   :  { %v324_v46 = vrot.slane %v323_v41, 4  ;;  %v1589_v54 = vmul.f32 %v1049_v29, %v2036_v5  ;;  %v361_v12 = vmul.f32 %v1576_v32, %v1428_v23  ;;  %v362_v16 = vmul.f32 %v1581_v57, %v1431_v61 }
  0x4b   :  { %v279_v40 = vadd.f32 %v278_v26, %v277_v27  ;;  %v302_v17 = vrot.slane %v301_v42, 2  ;;  %v345_v55 = vadd.f32 %v344_v35, %v343_v51  ;;  %v236_v58 = vmul.f32 %v987_v33, %v987_v33 }
  0x4c   :  { %v325_v52 = vadd.f32 %v324_v46, %v323_v41  ;;  %v988_v24 = vadd.f32 0.14285715, %v257_v36  ;;  %v346_v19 = vsel %vm73_vm0, %v340_v63, 0.0  ;;  %v1597_v20 = vmul.f32 %v1049_v29, %v2037_v4 }
  0x4d   :  { %v363_v22 = vmul.f32 %v1589_v54, %v1434_v25  ;;  %v365_v28 = vsel %vm73_vm0, %v361_v12, 0.0  ;;  %v366_v23 = vsel %vm73_vm0, %v362_v16, 0.0  ;;  %v280_v31 = vrot.slane %v279_v40, 1 }
  0x4e   :  { %v303_v61 = vadd.f32 %v302_v17, %v301_v42  ;;  %v326_v27 = vrot.slane %v325_v52, 2  ;;  %v347_v6 = vadd.f32 %v346_v19, %v345_v55  ;;  %v237_v43 = vmul.f32 10.0, %v236_v58 }
  0x4f   :  { %v259_v10 = vmul.f32 %v988_v24, %v988_v24  ;;  %v367_v37 = vadd.f32 %v366_v23, %v365_v28  ;;  %v364_v49 = vmul.f32 %v1597_v20, %v1446_v0  ;;  %v368_v29 = vsel %vm73_vm0, %v363_v22, 0.0 }
  0x50   :  { %v385_v11 = vmul.f32 %v1452_v30, %v1437_v50  ;;  %v281_v25 = vadd.f32 %v280_v31, %v279_v40  ;;  %v304_v26 = vrot.slane %v303_v61, 1  ;;  %v327_v41 = vadd.f32 %v326_v27, %v325_v52 }
  0x51   :  { %v386_v45 = vmul.f32 %v1455_v2, %v1440_v59  ;;  %v348_v42 = vrot.slane %v347_v6, 4  ;;  %v387_v63 = vmul.f32 %v1458_v7, %v1443_v60  ;;  %v388_v35 = vmul.f32 %v1461_v8, %v1449_v1 }
  0x52   :  { %v238_v33 = vmul.f32 1.442695, %v237_v43  ;;  %v260_v0 = vmul.f32 10.0, %v259_v10  ;;  %v369_v36 = vadd.f32 %v368_v29, %v367_v37  ;;  %v389_v46 = vsel %vm73_vm0, %v385_v11, 0.0 }
  0x53   :  { %v370_v51 = vsel %vm73_vm0, %v364_v49, 0.0  ;;  %v390_v5 = vsel %vm73_vm0, %v386_v45, 0.0  ;;  %v392_v12 = vsel %vm73_vm0, %v387_v63, 0.0  ;;  %v989_v16 = vadd.f32 0.14285715, %v281_v25 }
  0x54   :  { %v305_v40 = vadd.f32 %v304_v26, %v303_v61  ;;  %v328_v17 = vrot.slane %v327_v41, 1  ;;  %v391_v52 = vadd.f32 %v390_v5, %v389_v46  ;;  %v349_v55 = vadd.f32 %v348_v42, %v347_v6 }
  0x55   :  { %v394_v58 = vsel %vm73_vm0, %v388_v35, 0.0  ;;  %v409_v24 = vmul.f32 %v1464_v3, %v1437_v50  ;;  %v410_v19 = vmul.f32 %v1467_v9, %v1440_v59  ;;  %1050 = vpow2.f32 %v238_v33 }
  0x56   :  { %v261_v4 = vmul.f32 1.442695, %v260_v0  ;;  %v371_v22 = vadd.f32 %v370_v51, %v369_v36  ;;  %v393_v28 = vadd.f32 %v392_v12, %v391_v52  ;;  %v411_v23 = vmul.f32 %v1470_v13, %v1443_v60 }
  0x57   :  { %v412_v31 = vmul.f32 %v1473_v14, %v1449_v1  ;;  %v413_v61 = vsel %vm73_vm0, %v409_v24, 0.0  ;;  %v414_v27 = vsel %vm73_vm0, %v410_v19, 0.0  ;;  %v283_v6 = vmul.f32 %v989_v16, %v989_v16 }
  0x58   :  { %v990_v43 = vadd.f32 0.14285715, %v305_v40  ;;  %v329_v10 = vadd.f32 %v328_v17, %v327_v41  ;;  %v395_v37 = vadd.f32 %v394_v58, %v393_v28  ;;  %v350_v49 = vrot.slane %v349_v55, 2 }
  0x59   :  { %v415_v29 = vadd.f32 %v414_v27, %v413_v61  ;;  %v416_v11 = vsel %vm73_vm0, %v411_v23, 0.0  ;;  %v433_v25 = vmul.f32 %v1482_v21, %v1437_v50  ;;  %1052 = vpow2.f32 %v261_v4 }
  0x5a   :  { %v372_v26 = vrot.slane %v371_v22, 4  ;;  %v396_v45 = vrot.slane %v395_v37, 4  ;;  %v418_v42 = vsel %vm73_vm0, %v412_v31, 0.0  ;;  %v434_v35 = vmul.f32 %v1500_v62, %v1440_v59 }
  0x5b   :  { %v417_v63 = vadd.f32 %v416_v11, %v415_v29  ;;  %v435_v41 = vmul.f32 %v1503_v38, %v1443_v60  ;;  %v436_v33 = vmul.f32 %v1506_v39, %v1449_v1  ;;  %v307_v0 = vmul.f32 %v990_v43, %v990_v43 }
  0x5c   :  { %v991_v36 = vadd.f32 0.14285715, %v329_v10  ;;  %v397_v46 = vadd.f32 %v396_v45, %v395_v37  ;;  %v437_v51 = vsel %vm73_vm0, %v433_v25, 0.0  ;;  %v351_v5 = vadd.f32 %v350_v49, %v349_v55 }
  0x5d   :  { %v419_v12 = vadd.f32 %v418_v42, %v417_v63  ;;  %v438_v16 = vsel %vm73_vm0, %v434_v35, 0.0  ;;  %v440_v40 = vsel %vm73_vm0, %v435_v41, 0.0  ;;  %v284_v17 = vmul.f32 10.0, %v283_v6 }
  0x5e   :  { %v373_v52 = vadd.f32 %v372_v26, %v371_v22  ;;  %v398_v58 = vrot.slane %v397_v46, 2  ;;  %v439_v24 = vadd.f32 %v438_v16, %v437_v51  ;;  %v442_v4 = vsel %vm73_vm0, %v436_v33, 0.0 }
  0x5f   :  { %v420_v19 = vrot.slane %v419_v12, 4  ;;  %v457_v28 = vmul.f32 %v1510_v44, %v1437_v50  ;;  %v458_v23 = vmul.f32 %v1513_v56, %v1440_v59  ;;  %v308_v31 = vmul.f32 10.0, %v307_v0 }
  0x60   :  { %v331_v55 = vmul.f32 %v991_v36, %v991_v36  ;;  %v399_v61 = vadd.f32 %v398_v58, %v397_v46  ;;  %v441_v27 = vadd.f32 %v440_v40, %v439_v24  ;;  %v352_v43 = vrot.slane %v351_v5, 1 }
  0x61   :  { %v421_v10 = vadd.f32 %v420_v19, %v419_v12  ;;  %v459_v22 = vmul.f32 %v1516_v48, %v1443_v60  ;;  %v460_v6 = vmul.f32 %v1519_v34, %v1449_v1  ;;  %v374_v37 = vrot.slane %v373_v52, 2 }
  0x62   :  { %v400_v49 = vrot.slane %v399_v61, 1  ;;  %v443_v29 = vadd.f32 %v442_v4, %v441_v27  ;;  %v461_v11 = vsel %vm73_vm0, %v457_v28, 0.0  ;;  %v1652_v25 = vpop.eup %1050  ;;  %v285_v26 = vmul.f32 1.442695, %v284_v17 }
  0x63   :  { %v422_v45 = vrot.slane %v421_v10, 2  ;;  %v462_v42 = vsel %vm73_vm0, %v458_v23, 0.0  ;;  %v464_v63 = vsel %vm73_vm0, %v459_v22, 0.0  ;;  %v309_v35 = vmul.f32 1.442695, %v308_v31 }
  0x64   :  { %v332_v41 = vmul.f32 10.0, %v331_v55  ;;  %v444_v33 = vrot.slane %v443_v29, 4  ;;  %v463_v0 = vadd.f32 %v462_v42, %v461_v11  ;;  %v353_v36 = vadd.f32 %v352_v43, %v351_v5 }
  0x65   :  { %v466_v46 = vsel %vm73_vm0, %v460_v6, 0.0  ;;  %v481_v51 = vmul.f32 %v1536_v53, %v1437_v50  ;;  %v482_v12 = vmul.f32 %v1539_v18, %v1440_v59  ;;  %v375_v16 = vadd.f32 %v374_v37, %v373_v52 }
  0x66   :  { %v401_v40 = vadd.f32 %v400_v49, %v399_v61  ;;  %v445_v17 = vadd.f32 %v444_v33, %v443_v29  ;;  %v465_v58 = vadd.f32 %v464_v63, %v463_v0  ;;  %v1661_v24 = vpop.eup %1052  ;;  %1054 = vpow2.f32 %v285_v26 }
  0x67   :  { %v423_v19 = vadd.f32 %v422_v45, %v421_v10  ;;  %v483_v4 = vmul.f32 %v1544_v15, %v1443_v60  ;;  %v485_v5 = vsel %vm73_vm0, %v481_v51, 0.0  ;;  %1056 = vpow2.f32 %v309_v35 }
  0x68   :  { %v446_v28 = vrot.slane %v445_v17, 2  ;;  %v467_v23 = vadd.f32 %v466_v46, %v465_v58  ;;  %v484_v31 = vmul.f32 %v1547_v47, %v1449_v1  ;;  %v333_v55 = vmul.f32 1.442695, %v332_v41 }
  0x69   :  { %v992_v52 = vadd.f32 0.14285715, %v353_v36  ;;  %v486_v61 = vsel %vm73_vm0, %v482_v12, 0.0  ;;  %v488_v27 = vsel %vm73_vm0, %v483_v4, 0.0  ;;  %v376_v43 = vrot.slane %v375_v16, 1 }
  0x6a   :  { %v994_v22 = vadd.f32 0.14285715, %v401_v40  ;;  %v468_v10 = vrot.slane %v467_v23, 4  ;;  %v487_v6 = vadd.f32 %v486_v61, %v485_v5  ;;  %v424_v37 = vrot.slane %v423_v19, 1 }
  0x6b   :  { %v505_v49 = vmul.f32 %v1576_v32, %v1437_v50  ;;  %v506_v29 = vmul.f32 %v1581_v57, %v1440_v59  ;;  %v507_v11 = vmul.f32 %v1589_v54, %v1443_v60  ;;  %v447_v26 = vadd.f32 %v446_v28, %v445_v17 }
  0x6c   :  { %v469_v45 = vadd.f32 %v468_v10, %v467_v23  ;;  %v489_v42 = vadd.f32 %v488_v27, %v487_v6  ;;  %v490_v63 = vsel %vm73_vm0, %v484_v31, 0.0  ;;  %v355_v35 = vmul.f32 %v992_v52, %v992_v52 }
  0x6d   :  { %v508_v41 = vmul.f32 %v1597_v20, %v1449_v1  ;;  %v509_v33 = vsel %vm73_vm0, %v505_v49, 0.0  ;;  %v510_v0 = vsel %vm73_vm0, %v506_v29, 0.0  ;;  %1058 = vpow2.f32 %v333_v55 }
  0x6e   :  { %v377_v50 = vadd.f32 %v376_v43, %v375_v16  ;;  %v403_v36 = vmul.f32 %v994_v22, %v994_v22  ;;  %v470_v59 = vrot.slane %v469_v45, 2  ;;  %v425_v46 = vadd.f32 %v424_v37, %v423_v19 }
  0x6f   :  { %v491_v51 = vadd.f32 %v490_v63, %v489_v42  ;;  %v511_v60 = vadd.f32 %v510_v0, %v509_v33  ;;  %v512_v12 = vsel %vm73_vm0, %v507_v11, 0.0  ;;  %v448_v40 = vrot.slane %v447_v26, 1 }
  0x70   :  { %v471_v17 = vadd.f32 %v470_v59, %v469_v45  ;;  %v514_v58 = vsel %vm73_vm0, %v508_v41, 0.0  ;;  %v529_v1 = vmul.f32 %v1464_v3, %v1452_v30  ;;  %v356_v4 = vmul.f32 10.0, %v355_v35 }
  0x71   :  { %v492_v5 = vrot.slane %v491_v51, 4  ;;  %v513_v28 = vadd.f32 %v512_v12, %v511_v60  ;;  %v530_v16 = vmul.f32 %v1467_v9, %v1455_v2  ;;  %v263_v19 = vadd.f32 %v1661_v24, %v1652_v25 }
  0x72   :  { %v993_v23 = vadd.f32 0.14285715, %v377_v50  ;;  %v531_v31 = vmul.f32 %v1470_v13, %v1458_v7  ;;  %v532_v55 = vmul.f32 %v1473_v14, %v1461_v8  ;;  %v404_v52 = vmul.f32 10.0, %v403_v36 }
  0x73   :  { %v493_v61 = vadd.f32 %v492_v5, %v491_v51  ;;  %v515_v27 = vadd.f32 %v514_v58, %v513_v28  ;;  %v533_v43 = vsel %vm73_vm0, %v529_v1, 0.0  ;;  %v1694_v22 = vpop.eup %1054  ;;  %v995_v10 = vadd.f32 0.14285715, %v425_v46 }
  0x74   :  { %v449_v6 = vadd.f32 %v448_v40, %v447_v26  ;;  %v472_v37 = vrot.slane %v471_v17, 1  ;;  %v534_v49 = vsel %vm73_vm0, %v530_v16, 0.0  ;;  %v1697_v29 = vpop.eup %1056  ;;  %v536_v63 = vsel %vm73_vm0, %v531_v31, 0.0 }
  0x75   :  { %v494_v11 = vrot.slane %v493_v61, 2  ;;  %v516_v45 = vrot.slane %v515_v27, 4  ;;  %v535_v42 = vadd.f32 %v534_v49, %v533_v43  ;;  %v357_v35 = vmul.f32 1.442695, %v356_v4 }
  0x76   :  { %v379_v41 = vmul.f32 %v993_v23, %v993_v23  ;;  %v538_v33 = vsel %vm73_vm0, %v532_v55, 0.0  ;;  %v553_v0 = vmul.f32 %v1482_v21, %v1452_v30  ;;  %v405_v50 = vmul.f32 1.442695, %v404_v52 }
  0x77   :  { %v517_v36 = vadd.f32 %v516_v45, %v515_v27  ;;  %v537_v26 = vadd.f32 %v536_v63, %v535_v42  ;;  %v554_v59 = vmul.f32 %v1500_v62, %v1455_v2  ;;  %v427_v46 = vmul.f32 %v995_v10, %v995_v10 }
  0x78   :  { %v996_v51 = vadd.f32 0.14285715, %v449_v6  ;;  %v555_v60 = vmul.f32 %v1503_v38, %v1458_v7  ;;  %v556_v12 = vmul.f32 %v1506_v39, %v1461_v8  ;;  %v473_v40 = vadd.f32 %v472_v37, %v471_v17 }
  0x79   :  { %v495_v58 = vadd.f32 %v494_v11, %v493_v61  ;;  %v539_v1 = vadd.f32 %v538_v33, %v537_v26  ;;  %v557_v4 = vsel %vm73_vm0, %v553_v0, 0.0  ;;  %v287_v5 = vadd.f32 %v1694_v22, %v263_v19 }
  0x7a   :  { %v380_v28 = vmul.f32 10.0, %v379_v41  ;;  %v558_v16 = vsel %vm73_vm0, %v554_v59, 0.0  ;;  %v560_v23 = vsel %vm73_vm0, %v555_v60, 0.0  ;;  %v1713_v31 = vpop.eup %1058  ;;  %1060 = vpow2.f32 %v405_v50 }
  0x7b   :  { %v518_v55 = vrot.slane %v517_v36, 2  ;;  %v540_v52 = vrot.slane %v539_v1, 4  ;;  %v559_v27 = vadd.f32 %v558_v16, %v557_v4  ;;  %v428_v43 = vmul.f32 10.0, %v427_v46 }
  0x7c   :  { %v451_v10 = vmul.f32 %v996_v51, %v996_v51  ;;  %v562_v17 = vsel %vm73_vm0, %v556_v12, 0.0  ;;  %v577_v61 = vmul.f32 %v1510_v44, %v1452_v30  ;;  %v997_v6 = vadd.f32 0.14285715, %v473_v40 }
  0x7d   :  { %v496_v19 = vrot.slane %v495_v58, 1  ;;  %v541_v37 = vadd.f32 %v540_v52, %v539_v1  ;;  %v561_v49 = vadd.f32 %v560_v23, %v559_v27  ;;  %v311_v11 = vadd.f32 %v1697_v29, %v287_v5 }
  0x7e   :  { %1062 = vpow2.f32 %v357_v35  ;;  %v578_v45 = vmul.f32 %v1513_v56, %v1455_v2  ;;  %v579_v42 = vmul.f32 %v1516_v48, %v1458_v7  ;;  %v519_v63 = vadd.f32 %v518_v55, %v517_v36 }
  0x7f   :  { %v542_v41 = vrot.slane %v541_v37, 2  ;;  %v563_v33 = vadd.f32 %v562_v17, %v561_v49  ;;  %v580_v0 = vmul.f32 %v1519_v34, %v1461_v8  ;;  %v381_v50 = vmul.f32 1.442695, %v380_v28 }
  0x80   :  { %v429_v26 = vmul.f32 1.442695, %v428_v43  ;;  %v581_v59 = vsel %vm73_vm0, %v577_v61, 0.0  ;;  %v582_v46 = vsel %vm73_vm0, %v578_v45, 0.0  ;;  %v452_v51 = vmul.f32 10.0, %v451_v10 }
  0x81   :  { %v475_v35 = vmul.f32 %v997_v6, %v997_v6  ;;  %v497_v60 = vadd.f32 %v496_v19, %v495_v58  ;;  %v584_v12 = vsel %vm73_vm0, %v579_v42, 0.0  ;;  %v543_v40 = vadd.f32 %v542_v41, %v541_v37 }
  0x82   :  { %v564_v1 = vrot.slane %v563_v33, 4  ;;  %v583_v4 = vadd.f32 %v582_v46, %v581_v59  ;;  %v601_v36 = vmul.f32 %v1536_v53, %v1452_v30  ;;  %v520_v5 = vrot.slane %v519_v63, 1 }
  0x83   :  { %v586_v16 = vsel %vm73_vm0, %v580_v0, 0.0  ;;  %v602_v28 = vmul.f32 %v1539_v18, %v1455_v2  ;;  %v603_v23 = vmul.f32 %v1544_v15, %v1458_v7  ;;  %v544_v55 = vrot.slane %v543_v40, 1 }
  0x84   :  { %v565_v52 = vadd.f32 %v564_v1, %v563_v33  ;;  %v585_v58 = vadd.f32 %v584_v12, %v583_v4  ;;  %v604_v27 = vmul.f32 %v1547_v47, %v1461_v8  ;;  %1064 = vpow2.f32 %v381_v50 }
  0x85   :  { %v453_v43 = vmul.f32 1.442695, %v452_v51  ;;  %v605_v10 = vsel %vm73_vm0, %v601_v36, 0.0  ;;  %v606_v17 = vsel %vm73_vm0, %v602_v28, 0.0  ;;  %v1740_v61 = vadd.f32 %v1713_v31, %v311_v11 }
  0x86   :  { %1066 = vpow2.f32 %v429_v26  ;;  %v545_v6 = vadd.f32 %v544_v55, %v543_v40  ;;  %v566_v19 = vrot.slane %v565_v52, 2  ;;  %v476_v37 = vmul.f32 10.0, %v475_v35 }
  0x87   :  { %v587_v49 = vadd.f32 %v586_v16, %v585_v58  ;;  %v607_v45 = vadd.f32 %v606_v17, %v605_v10  ;;  %v608_v42 = vsel %vm73_vm0, %v603_v23, 0.0  ;;  %v1061_v41 = vpop.eup %1060  ;;  %v998_v33 = vadd.f32 0.14285715, %v497_v60 }
  0x88   :  { %v521_v0 = vadd.f32 %v520_v5, %v519_v63  ;;  %v610_v50 = vsel %vm73_vm0, %v604_v27, 0.0  ;;  %v625_v59 = vmul.f32 %v1576_v32, %v1452_v30  ;;  %1068 = vpow2.f32 %v453_v43 }
  0x89   :  { %v588_v46 = vrot.slane %v587_v49, 4  ;;  %v609_v11 = vadd.f32 %v608_v42, %v607_v45  ;;  %v626_v26 = vmul.f32 %v1581_v57, %v1455_v2  ;;  %v1000_v51 = vadd.f32 0.14285715, %v545_v6 }
  0x8a   :  { %v567_v35 = vadd.f32 %v566_v19, %v565_v52  ;;  %v627_v12 = vmul.f32 %v1589_v54, %v1458_v7  ;;  %v628_v60 = vmul.f32 %v1597_v20, %v1461_v8  ;;  %v629_v30 = vsel %vm73_vm0, %v625_v59, 0.0 }
  0x8b   :  { %v1752_v63 = vpop.eup %1062  ;;  %v589_v40 = vadd.f32 %v588_v46, %v587_v49  ;;  %v611_v1 = vadd.f32 %v610_v50, %v609_v11  ;;  %v630_v4 = vsel %vm73_vm0, %v626_v26, 0.0  ;;  %v407_v36 = vadd.f32 %v1061_v41, %v1652_v25 }
  0x8c   :  { %v477_v5 = vmul.f32 1.442695, %v476_v37  ;;  %v499_v2 = vmul.f32 %v998_v33, %v998_v33  ;;  %v999_v16 = vadd.f32 0.14285715, %v521_v0  ;;  %v631_v55 = vadd.f32 %v630_v4, %v629_v30 }
  0x8d   :  { %v590_v28 = vrot.slane %v589_v40, 2  ;;  %v612_v23 = vrot.slane %v611_v1, 4  ;;  %v632_v7 = vsel %vm73_vm0, %v627_v12, 0.0  ;;  %v547_v52 = vmul.f32 %v1000_v51, %v1000_v51 }
  0x8e   :  { %v568_v8 = vrot.slane %v567_v35, 1  ;;  %v634_v58 = vsel %vm73_vm0, %v628_v60, 0.0  ;;  %v649_v27 = vmul.f32 %v1482_v21, %v1464_v3  ;;  %v633_v17 = vadd.f32 %v632_v7, %v631_v55 }
  0x8f   :  { %v591_v43 = vadd.f32 %v590_v28, %v589_v40  ;;  %v613_v10 = vadd.f32 %v612_v23, %v611_v1  ;;  %v650_v25 = vmul.f32 %v1500_v62, %v1467_v9  ;;  %v1764_v6 = vadd.f32 %v1061_v41, %v1661_v24 }
  0x90   :  { %v523_v19 = vmul.f32 %v999_v16, %v999_v16  ;;  %v651_v37 = vmul.f32 %v1503_v38, %v1470_v13  ;;  %v652_v49 = vmul.f32 %v1506_v39, %v1473_v14  ;;  %v635_v33 = vadd.f32 %v634_v58, %v633_v17 }
  0x91   :  { %v592_v45 = vrot.slane %v591_v43, 1  ;;  %v614_v42 = vrot.slane %v613_v10, 2  ;;  %v653_v0 = vsel %vm73_vm0, %v649_v27, 0.0  ;;  %v1771_v50 = vpop.eup %1064  ;;  %1070 = vpow2.f32 %v477_v5 }
  0x92   :  { %v500_v59 = vmul.f32 10.0, %v499_v2  ;;  %v548_v46 = vmul.f32 10.0, %v547_v52  ;;  %v654_v24 = vsel %vm73_vm0, %v650_v25, 0.0  ;;  %v569_v11 = vadd.f32 %v568_v8, %v567_v35 }
  0x93   :  { %v1067_v41 = vpop.eup %1066  ;;  %v593_v26 = vadd.f32 %v592_v45, %v591_v43  ;;  %v615_v51 = vadd.f32 %v614_v42, %v613_v10  ;;  %v656_v12 = vsel %vm73_vm0, %v651_v37, 0.0  ;;  %v524_v60 = vmul.f32 10.0, %v523_v19 }
  0x94   :  { %v636_v40 = vrot.slane %v635_v33, 4  ;;  %v655_v1 = vadd.f32 %v654_v24, %v653_v0  ;;  %v673_v30 = vmul.f32 %v1510_v44, %v1464_v3  ;;  %v658_v16 = vsel %vm73_vm0, %v652_v49, 0.0 }
  0x95   :  { %v616_v4 = vrot.slane %v615_v51, 1  ;;  %v674_v5 = vmul.f32 %v1513_v56, %v1467_v9  ;;  %v675_v2 = vmul.f32 %v1516_v48, %v1470_v13  ;;  %v1782_v35 = vpop.eup %1068  ;;  %v549_v28 = vmul.f32 1.442695, %v548_v46 }
  0x96   :  { %v637_v23 = vadd.f32 %v636_v40, %v635_v33  ;;  %v657_v55 = vadd.f32 %v656_v12, %v655_v1  ;;  %v676_v7 = vmul.f32 %v1519_v34, %v1473_v14  ;;  %v431_v52 = vadd.f32 %v1067_v41, %v407_v36 }
  0x97   :  { %v501_v8 = vmul.f32 1.442695, %v500_v59  ;;  %v1001_v58 = vadd.f32 0.14285715, %v569_v11  ;;  %v1002_v27 = vadd.f32 0.14285715, %v593_v26  ;;  %v617_v43 = vadd.f32 %v616_v4, %v615_v51 }
  0x98   :  { %v659_v10 = vadd.f32 %v658_v16, %v657_v55  ;;  %v677_v17 = vsel %vm73_vm0, %v673_v30, 0.0  ;;  %v678_v25 = vsel %vm73_vm0, %v674_v5, 0.0  ;;  %v525_v19 = vmul.f32 1.442695, %v524_v60 }
  0x99   :  { %v638_v37 = vrot.slane %v637_v23, 2  ;;  %v679_v49 = vadd.f32 %v678_v25, %v677_v17  ;;  %v680_v45 = vsel %vm73_vm0, %v675_v2, 0.0  ;;  %1072 = vpow2.f32 %v549_v28 }
  0x9a   :  { %v660_v42 = vrot.slane %v659_v10, 4  ;;  %v682_v33 = vsel %vm73_vm0, %v676_v7, 0.0  ;;  %v697_v36 = vmul.f32 %v1536_v53, %v1464_v3  ;;  %v1793_v0 = vadd.f32 %v1067_v41, %v1694_v22 }
  0x9b   :  { %v571_v59 = vmul.f32 %v1001_v58, %v1001_v58  ;;  %v681_v46 = vadd.f32 %v680_v45, %v679_v49  ;;  %v698_v24 = vmul.f32 %v1539_v18, %v1467_v9  ;;  %v595_v11 = vmul.f32 %v1002_v27, %v1002_v27 }
  0x9c   :  { %v1003_v26 = vadd.f32 0.14285715, %v617_v43  ;;  %v661_v51 = vadd.f32 %v660_v42, %v659_v10  ;;  %v699_v12 = vmul.f32 %v1544_v15, %v1470_v13  ;;  %1074 = vpow2.f32 %v501_v8 }
  0x9d   :  { %v639_v60 = vadd.f32 %v638_v37, %v637_v23  ;;  %v683_v40 = vadd.f32 %v682_v33, %v681_v46  ;;  %v701_v1 = vsel %vm73_vm0, %v697_v36, 0.0  ;;  %v455_v30 = vadd.f32 %v1782_v35, %v431_v52 }
  0x9e   :  { %1076 = vpow2.f32 %v525_v19  ;;  %v662_v22 = vrot.slane %v661_v51, 2  ;;  %v700_v41 = vmul.f32 %v1547_v47, %v1473_v14  ;;  %v1803_v4 = vpop.eup %1070  ;;  %v572_v16 = vmul.f32 10.0, %v571_v59 }
  0x9f   :  { %v684_v5 = vrot.slane %v683_v40, 4  ;;  %v702_v2 = vsel %vm73_vm0, %v698_v24, 0.0  ;;  %v704_v28 = vsel %vm73_vm0, %v699_v12, 0.0  ;;  %v596_v55 = vmul.f32 10.0, %v595_v11 }
  0xa0   :  { %v619_v23 = vmul.f32 %v1003_v26, %v1003_v26  ;;  %v663_v7 = vadd.f32 %v662_v22, %v661_v51  ;;  %v703_v8 = vadd.f32 %v702_v2, %v701_v1  ;;  %v640_v58 = vrot.slane %v639_v60, 1 }
  0xa1   :  { %v685_v27 = vadd.f32 %v684_v5, %v683_v40  ;;  %v721_v52 = vmul.f32 %v1576_v32, %v1464_v3  ;;  %v722_v43 = vmul.f32 %v1581_v57, %v1467_v9  ;;  %v706_v25 = vsel %vm73_vm0, %v700_v41, 0.0 }
  0xa2   :  { %v664_v10 = vrot.slane %v663_v7, 1  ;;  %v705_v17 = vadd.f32 %v704_v28, %v703_v8  ;;  %v723_v19 = vmul.f32 %v1589_v54, %v1470_v13  ;;  %v724_v49 = vmul.f32 %v1597_v20, %v1473_v14 }
  0xa3   :  { %v686_v37 = vrot.slane %v685_v27, 2  ;;  %v725_v45 = vsel %vm73_vm0, %v721_v52, 0.0  ;;  %v726_v42 = vsel %vm73_vm0, %v722_v43, 0.0  ;;  %v573_v33 = vmul.f32 1.442695, %v572_v16 }
  0xa4   :  { %v597_v3 = vmul.f32 1.442695, %v596_v55  ;;  %v620_v36 = vmul.f32 10.0, %v619_v23  ;;  %v665_v59 = vadd.f32 %v664_v10, %v663_v7  ;;  %v707_v46 = vadd.f32 %v706_v25, %v705_v17 }
  0xa5   :  { %v687_v9 = vadd.f32 %v686_v37, %v685_v27  ;;  %v727_v24 = vadd.f32 %v726_v42, %v725_v45  ;;  %v728_v11 = vsel %vm73_vm0, %v723_v19, 0.0  ;;  %v641_v26 = vadd.f32 %v640_v58, %v639_v60 }
  0xa6   :  { %v1005_v51 = vadd.f32 0.14285715, %v665_v59  ;;  %v730_v13 = vsel %vm73_vm0, %v724_v49, 0.0  ;;  %v745_v14 = vmul.f32 %v1510_v44, %v1482_v21  ;;  %v1073_v12 = vpop.eup %1072  ;;  %v708_v1 = vrot.slane %v707_v46, 4 }
  0xa7   :  { %v688_v40 = vrot.slane %v687_v9, 1  ;;  %v729_v22 = vadd.f32 %v728_v11, %v727_v24  ;;  %v746_v41 = vmul.f32 %v1513_v56, %v1500_v62  ;;  %v1825_v16 = vadd.f32 %v1803_v4, %v455_v30 }
  0xa8   :  { %1078 = vpow2.f32 %v573_v33  ;;  %v747_v60 = vmul.f32 %v1516_v48, %v1503_v38  ;;  %v748_v5 = vmul.f32 %v1519_v34, %v1506_v39  ;;  %v709_v28 = vadd.f32 %v708_v1, %v707_v46 }
  0xa9   :  { %v689_v2 = vadd.f32 %v688_v40, %v687_v9  ;;  %v731_v55 = vadd.f32 %v730_v13, %v729_v22  ;;  %v749_v23 = vsel %vm73_vm0, %v745_v14, 0.0  ;;  %v1832_v7 = vpop.eup %1074  ;;  %v1835_v8 = vadd.f32 %v1073_v12, %v1764_v6 }
  0xaa   :  { %1080 = vpow2.f32 %v597_v3  ;;  %v621_v30 = vmul.f32 1.442695, %v620_v36  ;;  %v750_v58 = vsel %vm73_vm0, %v746_v41, 0.0  ;;  %v1004_v52 = vadd.f32 0.14285715, %v641_v26 }
  0xab   :  { %v1838_v27 = vpop.eup %1076  ;;  %v667_v43 = vmul.f32 %v1005_v51, %v1005_v51  ;;  %v710_v10 = vrot.slane %v709_v28, 2  ;;  %v752_v17 = vsel %vm73_vm0, %v747_v60, 0.0  ;;  %v732_v25 = vrot.slane %v731_v55, 4 }
  0xac   :  { %v751_v19 = vadd.f32 %v750_v58, %v749_v23  ;;  %v754_v37 = vsel %vm73_vm0, %v748_v5, 0.0  ;;  %v769_v49 = vmul.f32 %v1536_v53, %v1482_v21  ;;  %v1006_v6 = vadd.f32 0.14285715, %v689_v2 }
  0xad   :  { %v711_v45 = vadd.f32 %v710_v10, %v709_v28  ;;  %v770_v42 = vmul.f32 %v1539_v18, %v1500_v62  ;;  %v771_v33 = vmul.f32 %v1544_v15, %v1503_v38  ;;  %v1849_v3 = vadd.f32 %v1073_v12, %v1793_v0 }
  0xae   :  { %v733_v36 = vadd.f32 %v732_v25, %v731_v55  ;;  %v753_v59 = vadd.f32 %v752_v17, %v751_v19  ;;  %v772_v9 = vmul.f32 %v1547_v47, %v1506_v39  ;;  %1082 = vpow2.f32 %v621_v30 }
  0xaf   :  { %v643_v46 = vmul.f32 %v1004_v52, %v1004_v52  ;;  %v668_v24 = vmul.f32 10.0, %v667_v43  ;;  %v712_v11 = vrot.slane %v711_v45, 1  ;;  %v773_v13 = vsel %vm73_vm0, %v769_v49, 0.0 }
  0xb0   :  { %v734_v26 = vrot.slane %v733_v36, 2  ;;  %v755_v51 = vadd.f32 %v754_v37, %v753_v59  ;;  %v774_v14 = vsel %vm73_vm0, %v770_v42, 0.0  ;;  %v691_v40 = vmul.f32 %v1006_v6, %v1006_v6 }
  0xb1   :  { %v713_v1 = vadd.f32 %v712_v11, %v711_v45  ;;  %v775_v22 = vadd.f32 %v774_v14, %v773_v13  ;;  %v776_v0 = vsel %vm73_vm0, %v771_v33, 0.0  ;;  %v778_v60 = vsel %vm73_vm0, %v772_v9, 0.0 }
  0xb2   :  { %v735_v12 = vadd.f32 %v734_v26, %v733_v36  ;;  %v756_v41 = vrot.slane %v755_v51, 4  ;;  %v793_v5 = vmul.f32 %v1576_v32, %v1482_v21  ;;  %v644_v2 = vmul.f32 10.0, %v643_v46 }
  0xb3   :  { %v1007_v28 = vadd.f32 0.14285715, %v713_v1  ;;  %v777_v55 = vadd.f32 %v776_v0, %v775_v22  ;;  %v794_v23 = vmul.f32 %v1581_v57, %v1500_v62  ;;  %v795_v52 = vmul.f32 %v1589_v54, %v1503_v38 }
  0xb4   :  { %v736_v30 = vrot.slane %v735_v12, 1  ;;  %v757_v58 = vadd.f32 %v756_v41, %v755_v51  ;;  %v796_v43 = vmul.f32 %v1597_v20, %v1506_v39  ;;  %v797_v21 = vsel %vm73_vm0, %v793_v5, 0.0 }
  0xb5   :  { %v1865_v10 = vpop.eup %1078  ;;  %v715_v17 = vmul.f32 %v1007_v28, %v1007_v28  ;;  %v779_v25 = vadd.f32 %v778_v60, %v777_v55  ;;  %v798_v19 = vsel %vm73_vm0, %v794_v23, 0.0  ;;  %v669_v37 = vmul.f32 1.442695, %v668_v24 }
  0xb6   :  { %v692_v49 = vmul.f32 10.0, %v691_v40  ;;  %v737_v6 = vadd.f32 %v736_v30, %v735_v12  ;;  %v758_v62 = vrot.slane %v757_v58, 2  ;;  %v799_v38 = vadd.f32 %v798_v19, %v797_v21 }
  0xb7   :  { %v1869_v45 = vpop.eup %1080  ;;  %v716_v42 = vmul.f32 10.0, %v715_v17  ;;  %v780_v33 = vrot.slane %v779_v25, 4  ;;  %v800_v36 = vsel %vm73_vm0, %v795_v52, 0.0  ;;  %v802_v9 = vsel %vm73_vm0, %v796_v43, 0.0 }
  0xb8   :  { %v1008_v39 = vadd.f32 0.14285715, %v737_v6  ;;  %v759_v59 = vadd.f32 %v758_v62, %v757_v58  ;;  %v817_v46 = vmul.f32 %v1536_v53, %v1510_v44  ;;  %v645_v11 = vmul.f32 1.442695, %v644_v2 }
  0xb9   :  { %v781_v26 = vadd.f32 %v780_v33, %v779_v25  ;;  %v801_v24 = vadd.f32 %v800_v36, %v799_v38  ;;  %v818_v51 = vmul.f32 %v1539_v18, %v1513_v56  ;;  %v819_v40 = vmul.f32 %v1544_v15, %v1516_v48 }
  0xba   :  { %v739_v13 = vmul.f32 %v1008_v39, %v1008_v39  ;;  %v760_v14 = vrot.slane %v759_v59, 1  ;;  %v820_v1 = vmul.f32 %v1547_v47, %v1519_v34  ;;  %1084 = vpow2.f32 %v669_v37 }
  0xbb   :  { %v782_v22 = vrot.slane %v781_v26, 2  ;;  %v803_v0 = vadd.f32 %v802_v9, %v801_v24  ;;  %v821_v12 = vsel %vm73_vm0, %v817_v46, 0.0  ;;  %v1882_v41 = vpop.eup %1082  ;;  %v693_v60 = vmul.f32 1.442695, %v692_v49 }
  0xbc   :  { %v717_v5 = vmul.f32 1.442695, %v716_v42  ;;  %v740_v2 = vmul.f32 10.0, %v739_v13  ;;  %v761_v28 = vadd.f32 %v760_v14, %v759_v59  ;;  %v822_v30 = vsel %vm73_vm0, %v818_v51, 0.0 }
  0xbd   :  { %v783_v55 = vadd.f32 %v782_v22, %v781_v26  ;;  %v804_v23 = vrot.slane %v803_v0, 4  ;;  %v824_v58 = vsel %vm73_vm0, %v819_v40, 0.0  ;;  %1086 = vpow2.f32 %v645_v11 }
  0xbe   :  { %v1009_v52 = vadd.f32 0.14285715, %v761_v28  ;;  %v823_v43 = vadd.f32 %v822_v30, %v821_v12  ;;  %v826_v17 = vsel %vm73_vm0, %v820_v1, 0.0  ;;  %v841_v19 = vmul.f32 %v1576_v32, %v1510_v44 }
  0xbf   :  { %v784_v25 = vrot.slane %v783_v55, 1  ;;  %v805_v21 = vadd.f32 %v804_v23, %v803_v0  ;;  %v842_v37 = vmul.f32 %v1581_v57, %v1513_v56  ;;  %1088 = vpow2.f32 %v693_v60 }
  0xc0   :  { %v763_v49 = vmul.f32 %v1009_v52, %v1009_v52  ;;  %v825_v6 = vadd.f32 %v824_v58, %v823_v43  ;;  %v843_v62 = vmul.f32 %v1589_v54, %v1516_v48  ;;  %1090 = vpow2.f32 %v717_v5 }
  0xc1   :  { %v741_v42 = vmul.f32 1.442695, %v740_v2  ;;  %v785_v33 = vadd.f32 %v784_v25, %v783_v55  ;;  %v806_v38 = vrot.slane %v805_v21, 2  ;;  %v844_v59 = vmul.f32 %v1597_v20, %v1519_v34 }
  0xc2   :  { %v764_v36 = vmul.f32 10.0, %v763_v49  ;;  %v827_v39 = vadd.f32 %v826_v17, %v825_v6  ;;  %v845_v44 = vsel %vm73_vm0, %v841_v19, 0.0  ;;  %v846_v56 = vsel %vm73_vm0, %v842_v37, 0.0 }
  0xc3   :  { %v1010_v9 = vadd.f32 0.14285715, %v785_v33  ;;  %v807_v46 = vadd.f32 %v806_v38, %v805_v21  ;;  %v848_v11 = vsel %vm73_vm0, %v843_v62, 0.0  ;;  %v847_v48 = vadd.f32 %v846_v56, %v845_v44 }
  0xc4   :  { %v765_v26 = vmul.f32 1.442695, %v764_v36  ;;  %v828_v24 = vrot.slane %v827_v39, 4  ;;  %v850_v51 = vsel %vm73_vm0, %v844_v59, 0.0  ;;  %v865_v40 = vmul.f32 %v1576_v32, %v1536_v53 }
  0xc5   :  { %v787_v13 = vmul.f32 %v1010_v9, %v1010_v9  ;;  %v808_v14 = vrot.slane %v807_v46, 1  ;;  %v866_v34 = vmul.f32 %v1581_v57, %v1539_v18  ;;  %v575_v1 = vadd.f32 %v1865_v10, %v1835_v8 }
  0xc6   :  { %v829_v22 = vadd.f32 %v828_v24, %v827_v39  ;;  %v849_v0 = vadd.f32 %v848_v11, %v847_v48  ;;  %v867_v12 = vmul.f32 %v1589_v54, %v1544_v15  ;;  %1092 = vpow2.f32 %v765_v26 }
  0xc7   :  { %v788_v60 = vmul.f32 10.0, %v787_v13  ;;  %v809_v5 = vadd.f32 %v808_v14, %v807_v46  ;;  %v869_v2 = vsel %vm73_vm0, %v865_v40, 0.0  ;;  %v1085_v28 = vpop.eup %1084  ;;  %v868_v53 = vmul.f32 %v1597_v20, %v1547_v47 }
  0xc8   :  { %v830_v55 = vrot.slane %v829_v22, 2  ;;  %v851_v23 = vadd.f32 %v850_v51, %v849_v0  ;;  %v870_v18 = vsel %vm73_vm0, %v866_v34, 0.0  ;;  %1094 = vpow2.f32 %v741_v42 }
  0xc9   :  { %v789_v32 = vmul.f32 1.442695, %v788_v60  ;;  %v1011_v57 = vadd.f32 0.14285715, %v809_v5  ;;  %v872_v8 = vsel %vm73_vm0, %v867_v12, 0.0  ;;  %v359_v15 = vadd.f32 %v1752_v63, %v1740_v61 }
  0xca   :  { %v831_v54 = vadd.f32 %v830_v55, %v829_v22  ;;  %v852_v30 = vrot.slane %v851_v23, 4  ;;  %v871_v58 = vadd.f32 %v870_v18, %v869_v2  ;;  %v1914_v52 = vpop.eup %1086  ;;  %v456_v43 = vadd.f32 %v1782_v35, %v1697_v29 }
  0xcb   :  { %v503_v47 = vadd.f32 %v1832_v7, %v1825_v16  ;;  %1096 = vpow2.f32 %v789_v32  ;;  %v811_v20 = vmul.f32 %v1011_v57, %v1011_v57  ;;  %v874_v19 = vsel %vm73_vm0, %v868_v53, 0.0 }
  0xcc   :  { %v832_v17 = vrot.slane %v831_v54, 1  ;;  %v853_v25 = vadd.f32 %v852_v30, %v851_v23  ;;  %v873_v21 = vadd.f32 %v872_v8, %v871_v58  ;;  %v1089_v37 = vpop.eup %1088  ;;  %v599_v61 = vadd.f32 %v1869_v45, %v575_v1 }
  0xcd   :  { %v671_v49 = vadd.f32 %v1085_v28, %v1849_v3  ;;  %v812_v6 = vmul.f32 10.0, %v811_v20  ;;  %v1923_v62 = vpop.eup %1090  ;;  %v576_v35 = vadd.f32 %v1865_v10, %v456_v43  ;;  %v383_v38 = vadd.f32 %v1771_v50, %v359_v15 }
  0xce   :  { %v833_v42 = vadd.f32 %v832_v17, %v831_v54  ;;  %v854_v29 = vrot.slane %v853_v25, 2  ;;  %v875_v33 = vadd.f32 %v874_v19, %v873_v21  ;;  %v527_v36 = vadd.f32 %v1838_v27, %v503_v47 }
  0xcf   :  { %v813_v16 = vmul.f32 1.442695, %v812_v6  ;;  %v623_v44 = vadd.f32 %v1882_v41, %v599_v61  ;;  %v695_v9 = vadd.f32 %v1089_v37, %v671_v49  ;;  %v672_v11 = vadd.f32 %v1085_v28, %v576_v35 }
  0xd0   :  { %v1012_v39 = vadd.f32 0.14285715, %v833_v42  ;;  %v855_v59 = vadd.f32 %v854_v29, %v853_v25  ;;  %v876_v3 = vrot.slane %v875_v33, 4  ;;  %v480_v60 = vadd.f32 %v1803_v4, %v1713_v31 }
  0xd1   :  { %1098 = vpow2.f32 %v813_v16  ;;  %v647_v51 = vadd.f32 %v1914_v52, %v623_v44  ;;  %v719_v13 = vadd.f32 %v1923_v62, %v695_v9  ;;  %v504_v15 = vadd.f32 %v1832_v7, %v1752_v63 }
  0xd2   :  { %v835_v46 = vmul.f32 %v1012_v39, %v1012_v39  ;;  %v856_v56 = vrot.slane %v855_v59, 1  ;;  %v877_v26 = vadd.f32 %v876_v3, %v875_v33  ;;  %1100 = vlog2.f32 %v383_v38 }
  0xd3   :  { %v1093_v24 = vpop.eup %1092  ;;  %1102 = vlog2.f32 %v527_v36  ;;  %v600_v18 = vadd.f32 %v1869_v45, %v480_v60  ;;  %v528_v31 = vadd.f32 %v1838_v27, %v1771_v50  ;;  %v624_v45 = vadd.f32 %v1882_v41, %v504_v15 }
  0xd4   :  { %v836_v48 = vmul.f32 10.0, %v835_v46  ;;  %v857_v10 = vadd.f32 %v856_v56, %v855_v59  ;;  %v878_v14 = vrot.slane %v877_v26, 2  ;;  %v767_v22 = vadd.f32 %v1093_v24, %v672_v11 }
  0xd5   :  { %v1095_v40 = vpop.eup %1094  ;;  %v696_v30 = vadd.f32 %v1089_v37, %v600_v18  ;;  %v648_v20 = vadd.f32 %v1914_v52, %v528_v31  ;;  %v720_v50 = vadd.f32 %v1923_v62, %v624_v45  ;;  %v1147_v11 = vmov 0.0  }
  0xd6   :  { %v837_v34 = vmul.f32 1.442695, %v836_v48  ;;  %v1013_v1 = vadd.f32 0.14285715, %v857_v10  ;;  %v879_v0 = vadd.f32 %v878_v14, %v877_v26  ;;  %v743_v2 = vadd.f32 %v1095_v40, %v719_v13 }
  0xd7   :  { %v768_v25 = vadd.f32 %v1093_v24, %v696_v30  ;;  %v744_v27 = vadd.f32 %v1095_v40, %v648_v20 }
  0xd8   :  { %v1097_v12 = vpop.eup %1096  ;;  %1104 = vpow2.f32 %v837_v34  ;;  %v859_v5 = vmul.f32 %v1013_v1, %v1013_v1  ;;  %v880_v28 = vrot.slane %v879_v0, 1 }
  0xd9   :  { %1106 = vlog2.f32 %v647_v51  ;;  %v791_v23 = vadd.f32 %v1097_v12, %v767_v22  ;;  %v792_v35 = vadd.f32 %v1097_v12, %v720_v50 }
  0xda   :  { %v860_v55 = vmul.f32 10.0, %v859_v5  ;;  %v881_v53 = vadd.f32 %v880_v28, %v879_v0  ;;  %1108 = vlog2.f32 %v743_v2 }
  0xdc   :  { %v861_v32 = vmul.f32 1.442695, %v860_v55  ;;  %v1014_v57 = vadd.f32 0.14285715, %v881_v53 }
  0xde   :  { %v1099_v8 = vpop.eup %1098  ;;  %1110 = vpow2.f32 %v861_v32  ;;  %v883_v54 = vmul.f32 %v1014_v57, %v1014_v57 }
  0xdf   :  { %v815_v4 = vadd.f32 %v1099_v8, %v791_v23  ;;  %v1101_v58 = vpop.eup %1100  ;;  %v816_v41 = vadd.f32 %v1099_v8, %v744_v27 }
  0xe0   :  { %v884_v43 = vmul.f32 10.0, %v883_v54  ;;  %v1103_v47 = vpop.eup %1102  ;;  %v890_v21 = vmul.f32 0.6931472, %v1101_v58 }
  0xe1   :  { %1112 = vlog2.f32 %v815_v4  ;;  %v900_v63 = vmul.f32 0.6931472, %v1103_v47 }
  0xe2   :  { %v885_v17 = vmul.f32 1.442695, %v884_v43  ;;  %v1015_v37 = vadd.f32 -1.9459101, %v890_v21 }
  0xe3   :  { %v1017_v49 = vadd.f32 -1.9459101, %v900_v63 }
  0xe4   :  { %1114 = vpow2.f32 %v885_v17  ;;  %vm892_vm1 = vcmp.ne.f32.partialorder %v1015_v37, %v1015_v37 }
  0xe5   :  { %v1105_v19 = vpop.eup %1104  ;;  %vm902_vm2 = vcmp.ne.f32.partialorder %v1017_v49, %v1017_v49  ;;  %vm1942_vm4 = vmxor %vm892_vm1, %vm1146_vm3 }
  0xe6   :  { %v1107_v7 = vpop.eup %1106  ;;  %v839_v61 = vadd.f32 %v1105_v19, %v768_v25  ;;  %v840_v36 = vadd.f32 %v1105_v19, %v792_v35  ;;  %vm1947_vm5 = vmxor %vm902_vm2, %vm1146_vm3  ;;  %v1016_v26 = vsel %vm1942_vm4, 1.0, %v1147_v11  ;;  %v894_v12 = vsel %vm1942_vm4, %v1015_v37, 0.0 }
  0xe7   :  { %v910_v6 = vmul.f32 0.6931472, %v1107_v7  ;;  %v1109_v42 = vpop.eup %1108  ;;  %v1018_v24 = vsel %vm1947_vm5, 1.0, %v1147_v11  ;;  %v904_v60 = vsel %vm1947_vm5, %v1017_v49, 0.0  ;;  %vm971_vm2 = vcmask 0  }
  0xe8   :  { %v920_v33 = vmul.f32 0.6931472, %v1109_v42  ;;  %v908_v51 = vadd.f32 %v1018_v24, %v1016_v26  ;;  %v905_v55 = vadd.f32 %v904_v60, %v894_v12 }
  0xe9   :  { %v1019_v52 = vadd.f32 -1.9459101, %v910_v6 }
  0xea   :  { %v1021_v44 = vadd.f32 -1.9459101, %v920_v33 }
  0xeb   :  { %v1111_v29 = vpop.eup %1110  ;;  %vm912_vm6 = vcmp.ne.f32.partialorder %v1019_v52, %v1019_v52 }
  0xec   :  { %v863_v16 = vadd.f32 %v1111_v29, %v839_v61  ;;  %v864_v39 = vadd.f32 %v1111_v29, %v816_v41  ;;  %vm1956_vm7 = vmxor %vm912_vm6, %vm1146_vm3  ;;  %vm922_vm8 = vcmp.ne.f32.partialorder %v1021_v44, %v1021_v44 }
  0xed   :  { %v1020_v13 = vsel %vm1956_vm7, 1.0, %v1147_v11  ;;  %vm1963_vm9 = vmxor %vm922_vm8, %vm1146_vm3  ;;  %v914_v23 = vsel %vm1956_vm7, %v1019_v52, 0.0 }
  0xee   :  { %v1113_v38 = vpop.eup %1112  ;;  %1116 = vlog2.f32 %v863_v16  ;;  %v918_v40 = vadd.f32 %v1020_v13, %v908_v51  ;;  %v1022_v1 = vsel %vm1963_vm9, 1.0, %v1147_v11  ;;  %v915_v31 = vadd.f32 %v914_v23, %v905_v55 }
  0xef   :  { %v930_v9 = vmul.f32 0.6931472, %v1113_v38  ;;  %v924_v54 = vsel %vm1963_vm9, %v1021_v44, 0.0 }
  0xf0   :  { %v928_v5 = vadd.f32 %v1022_v1, %v918_v40  ;;  %v925_v47 = vadd.f32 %v924_v54, %v915_v31 }
  0xf1   :  { %v1115_v3 = vpop.eup %1114  ;;  %v1023_v10 = vadd.f32 -1.9459101, %v930_v9 }
  0xf2   :  { %v887_v46 = vadd.f32 %v1115_v3, %v840_v36  ;;  %v888_v56 = vadd.f32 %v1115_v3, %v864_v39 }
  0xf3   :  { %vm932_vm10 = vcmp.ne.f32.partialorder %v1023_v10, %v1023_v10 }
  0xf4   :  { %1118 = vlog2.f32 %v887_v46  ;;  %vm1970_vm11 = vmxor %vm932_vm10, %vm1146_vm3 }
  0xf5   :  { %1120 = vlog2.f32 %v888_v56  ;;  %v1024_v28 = vsel %vm1970_vm11, 1.0, %v1147_v11  ;;  %v934_v45 = vsel %vm1970_vm11, %v1023_v10, 0.0 }
  0xf6   :  { %v938_v32 = vadd.f32 %v1024_v28, %v928_v5  ;;  %v935_v21 = vadd.f32 %v934_v45, %v925_v47 }
  0xfb   :  { %v1117_v34 = vpop.eup %1116 }
  0xfc   :  { %v940_v0 = vmul.f32 0.6931472, %v1117_v34 }
  0xfe   :  { %v1025_v2 = vadd.f32 -1.9459101, %v940_v0 }
 0x100   :  { %vm942_vm12 = vcmp.ne.f32.partialorder %v1025_v2, %v1025_v2 }
 0x101   :  { %vm1983_vm13 = vmxor %vm942_vm12, %vm1146_vm3  ;;  %v1119_v18 = vpop.eup %1118 }
 0x102   :  { %v1121_v57 = vpop.eup %1120  ;;  %v1026_v8 = vsel %vm1983_vm13, 1.0, %v1147_v11  ;;  %v950_v15 = vmul.f32 0.6931472, %v1119_v18  ;;  %v944_v63 = vsel %vm1983_vm13, %v1025_v2, 0.0 }
 0x103   :  { %v960_v4 = vmul.f32 0.6931472, %v1121_v57  ;;  %v948_v58 = vadd.f32 %v1026_v8, %v938_v32  ;;  %v945_v7 = vadd.f32 %v944_v63, %v935_v21 }
 0x104   :  { %v1027_v30 = vadd.f32 -1.9459101, %v950_v15 }
 0x105   :  { %v1029_v43 = vadd.f32 -1.9459101, %v960_v4 }
 0x106   :  { %vm952_vm14 = vcmp.ne.f32.partialorder %v1027_v30, %v1027_v30 }
 0x107   :  { %vm953_vm15 = vmxor %vm952_vm14, %vm1146_vm3  ;;  %vm962_vm0 = vcmp.ne.f32.partialorder %v1029_v43, %v1029_v43 }
 0x108   :  { %v1028_v20 = vsel %vm953_vm15, 1.0, %v1147_v11  ;;  %vm963_vm1 = vmxor %vm962_vm0, %vm1146_vm3  ;;  %v954_v50 = vsel %vm953_vm15, %v1027_v30, 0.0 }
 0x109   :  { %v958_v17 = vadd.f32 %v1028_v20, %v948_v58  ;;  %v1030_v25 = vsel %vm963_vm1, 1.0, %v1147_v11  ;;  %v955_v27 = vadd.f32 %v954_v50, %v945_v7  ;;  %v964_v61 = vsel %vm963_vm1, %v1029_v43, 0.0 }
 0x10b   :  { %v968_v19 = vadd.f32 %v1030_v25, %v958_v17  ;;  %v965_v37 = vadd.f32 %v964_v61, %v955_v27 }
 0x10d   :  { %1122 = vrcp.f32 %v968_v19 }
 0x11a   :  { %v1123_v49 = vpop.eup %1122 }
 0x11b   :  { %v970_v6 = vmul.f32 %v1123_v49, %v965_v37 }
 0x11d   :  { %972 = vst.msk [vmem:[#allocation2] sm:$0x1] %vm971_vm2, %v970_v6 }
 0x11e   :  { %1135 = shalt.err (!%p1132_p4)
}
 0x11f   :  { %982 = dma.vmem_to_hbm [thread:$0]  %s980_s12, 16, %s2001_s1, [#allocation3]  }
 0x120   :  { %1144 = dma.done.wait [#allocation3], 16  }
 0x121   :  { %1145 = vsyncadd [#allocation3], 4294967280 }
 0x122   :  { %986 = vsyncpa [#allocation3], 1 }

</bundles_post_ra>
